<compile_context>
chip_gen: v5e
topology: v5e:2x2
jax: 0.10.0
libtpu: 0.0.40
codegen_flags: <defaults>
</compile_context>

<pallas_src>
import jax
import jax.numpy as jnp
from jax.experimental import pallas as pl
from jax.experimental.pallas import tpu as pltpu


def dense_layer_kernel(x_ref, s1_ref, b1_ref, w1_ref, b2_ref, w2_ref,
                       m0_ref, m1_ref, pool_ref, exp_ref, fc1_ref, fc2_ref,
                       out_ref):
    N = x_ref.shape[1]
    Cg = fc2_ref.shape[0]

    # norm1 (folded eval-mode BN) + relu1 in f32; cast to bf16 for the MXU.
    h0 = jnp.maximum(x_ref[...] * s1_ref[...] + b1_ref[...], 0.0).astype(jnp.bfloat16)

    # conv1 (1x1 Conv1d) == channel matmul.  bn2's scale was pre-folded into w1
    # in the wrapper, so only the bias add + relu2 remain here.
    h1 = jnp.dot(w1_ref[...], h0, preferred_element_type=jnp.float32)       # (C1, N)
    h1 = jnp.maximum(h1 + b2_ref[...], 0.0).astype(jnp.bfloat16)

    # conv2 (k=3, pad=1): one tap-stacked matmul, then shift the l-1 / l+1 tap
    # outputs by one lane (output side, XLU roll) and zero the per-segment
    # boundary lane with precomputed {0,1} masks.
    y_all = jnp.dot(w2_ref[...], h1, preferred_element_type=jnp.float32)    # (3*Cg, N)
    y_m1 = y_all[0 * Cg:1 * Cg]          # tap applied to h1[l-1]
    y_c = y_all[1 * Cg:2 * Cg]           # tap applied to h1[l]
    y_p1 = y_all[2 * Cg:3 * Cg]          # tap applied to h1[l+1]
    y = (y_c
         + m0_ref[...] * pltpu.roll(y_m1, 1, axis=1)
         + m1_ref[...] * pltpu.roll(y_p1, N - 1, axis=1))                   # (Cg, N)

    # SE block, vectorized across all Bt batch segments on the otherwise-idle
    # MXU (replaces the previous serial per-segment XLU/EUP chain and Bt small
    # stores with one chain and one full-block store):
    #   pooled  = y @ P                 block-average pooling   (Cg, Bt)
    #   hid     = relu(fc1 @ pooled)                            (Cr, Bt)
    #   scale   = sigmoid(fc2 @ hid)                            (Cg, Bt)
    #   scale_b = scale @ E             broadcast back          (Cg, N)
    pooled = jnp.dot(y.astype(jnp.bfloat16), pool_ref[...],
                     preferred_element_type=jnp.float32)
    hid = jnp.maximum(jnp.dot(fc1_ref[...], pooled.astype(jnp.bfloat16),
                              preferred_element_type=jnp.float32), 0.0)
    scale = jax.nn.sigmoid(jnp.dot(fc2_ref[...], hid.astype(jnp.bfloat16),
                                   preferred_element_type=jnp.float32))
    scale_b = jnp.dot(scale.astype(jnp.bfloat16), exp_ref[...],
                      preferred_element_type=jnp.float32)

    # One unmasked, lane-dense store of the whole block.
    out_ref[...] = (y * scale_b).astype(out_ref.dtype)

    # TODO(synk): dropout is identity in eval mode / drop_rate == 0, and the
    # _NonLocalBlockND submodule is never called in forward(); neither is emitted.


def prepare_params(params):
    """Fold / repack the module parameters into kernel-ready operands."""
    s1, b1, w1, s2, b2, w2, fc1, fc2 = params
    # s2 * (W1 @ h0) == (diag(s2) W1) @ h0  -> fold bn2 scale into conv1 weight.
    w1f = (s2 * w1).astype(jnp.bfloat16)                  # (C1, C_in)
    # Stack the 3 conv2 taps along the output dim for one MXU call.
    Cg, C1 = w2.shape[1], w2.shape[2]
    w2s = w2.reshape(3 * Cg, C1).astype(jnp.bfloat16)     # rows [0:Cg]=tap l-1, [Cg:2Cg]=tap l, [2Cg:]=tap l+1
    return (s1, b1, w1f, b2, w2s,
            fc1.astype(jnp.bfloat16),                     # (Cr, Cg)
            fc2.astype(jnp.bfloat16))                     # (Cg, Cr)


def _num_tensorcores_per_device():
    """Best-effort TensorCores per device (2 on v7x / megacore chips, else 1)."""
    try:
        d = jax.devices()[0]
    except Exception:
        return 1
    for attr in ("num_cores", "core_count", "num_tensorcores"):
        n = getattr(d, attr, None)
        if isinstance(n, int) and n > 0:
            return n
    kind = str(getattr(d, "device_kind", "")).lower()
    if any(tag in kind for tag in ("v7", "7x", "v5p", "v4", "v3")):
        return 2                                          # dual-TC / megacore
    return 1                                              # v5e / v6e: 1 TC


def _pick_batch_tile(B, L, *, n_cores=None, max_cols=2048):
    """Generation-aware Bt (batch segments stacked on lanes per grid step).

    Single-TC (v5e/v6e): largest Bt within the lane-width budget (ideally Bt=B,
    grid=(1,)).  Dual-TC (v7x): largest Bt such that the number of grid steps is
    a multiple of the TC count, so the 'parallel' axis shards across cores.
    """
    if n_cores is None:
        n_cores = _num_tensorcores_per_device()
    divisors = [d for d in range(1, B + 1) if B % d == 0]
    fitting = [d for d in divisors if d * L <= max_cols] or [1]
    if n_cores <= 1:
        return fitting[-1]
    for d in reversed(fitting):
        if (B // d) % n_cores == 0:
            return d
    return fitting[-1]


def _full_spec(a):
    ndim = a.ndim
    return pl.BlockSpec(a.shape, lambda i, _n=ndim: (0,) * _n)


def dense_layer_forward_stacked(x2, prep, *, seg_len, batch_tile=None,
                                out_dtype=jnp.float32, max_cols=2048):
    """Layout-native forward: x2 is (C_in, B*L) with batches stacked on lanes.

    Returns (Cg, B*L) in the same lane-stacked layout so consecutive DenseNet
    layers never pay HBM transpose passes (channel concat = leading-axis concat).
    """
    s1, b1, w1f, b2, w2s, fc1, fc2 = prep
    C_in, total = x2.shape
    L = seg_len
    B = total // L
    assert B * L == total
    C1 = w1f.shape[0]
    Cg, Cr = fc2.shape

    Bt = _pick_batch_tile(B, L, max_cols=max_cols) if batch_tile is None else batch_tile
    assert B % Bt == 0
    N = Bt * L
    steps = B // Bt

    # Precomputed per-step constants (same for every grid step).
    pos = jnp.arange(N, dtype=jnp.int32)
    in_seg = pos % L
    seg_id = pos // L
    m0 = (in_seg != 0).astype(jnp.float32).reshape(1, N)        # kill wrapped lane of the l-1 tap
    m1 = (in_seg != L - 1).astype(jnp.float32).reshape(1, N)    # kill wrapped lane of the l+1 tap
    onehot = (seg_id[:, None] == jnp.arange(Bt, dtype=jnp.int32)[None, :])
    pool = (onehot.astype(jnp.float32) / L).astype(jnp.bfloat16)   # (N, Bt) block-average
    expand = jnp.transpose(onehot).astype(jnp.bfloat16)            # (Bt, N) broadcast-back

    out2 = pl.pallas_call(
        dense_layer_kernel,
        out_shape=jax.ShapeDtypeStruct((Cg, total), out_dtype),
        grid=(steps,),
        in_specs=[
            pl.BlockSpec((C_in, N), lambda i: (0, i)),    # x, batches stacked on lanes
            _full_spec(s1),                               # bn1 scale (f32)
            _full_spec(b1),                               # bn1 bias (f32)
            _full_spec(w1f),                              # conv1 weight, bn2-scale folded (bf16)
            _full_spec(b2),                               # bn2 bias (f32)
            _full_spec(w2s),                              # conv2 weight, tap-stacked (bf16)
            _full_spec(m0),                               # l-1 boundary mask (f32)
            _full_spec(m1),                               # l+1 boundary mask (f32)
            _full_spec(pool),                             # (N, Bt) block-average pooling (bf16)
            _full_spec(expand),                           # (Bt, N) scale broadcast (bf16)
            _full_spec(fc1),                              # SE fc1 (Cr, Cg) (bf16)
            _full_spec(fc2),                              # SE fc2 (Cg, Cr) (bf16)
        ],
        out_specs=pl.BlockSpec((Cg, N), lambda i: (0, i)),   # lane-dense output slab
        compiler_params=pltpu.CompilerParams(
            # Only matters on dual-TC chips (v7x / megacore); harmless elsewhere.
            dimension_semantics=("parallel",)),
    )(x2, s1, b1, w1f, b2, w2s, m0, m1, pool, expand, fc1, fc2)

    return out2


def dense_layer_forward(x, params, *, batch_tile=None, out_dtype=jnp.float32):
    """Convenience (B, C, L) wrapper.

    NOTE: the two transposes here are full HBM relayout passes issued by XLA.
    In a full DenseNet, keep activations in the lane-stacked (C, B*L) layout and
    call `dense_layer_forward_stacked` directly so they never happen.
    """
    prep = prepare_params(params)
    B, C_in, L = x.shape
    Cg = prep[6].shape[0]
    x2 = jnp.transpose(x, (1, 0, 2)).reshape(C_in, B * L)
    out2 = dense_layer_forward_stacked(x2, prep, seg_len=L,
                                       batch_tile=batch_tile, out_dtype=out_dtype)
    return jnp.transpose(out2.reshape(Cg, B, L), (1, 0, 2))


def ref_forward_bf16(x, prep):
    """Pure-JAX reference mirroring the kernel's bf16-matmul precision exactly."""
    s1, b1, w1f, b2, w2s, fc1, fc2 = prep
    B, C_in, L = x.shape
    Cg = fc2.shape[0]
    h0 = jnp.maximum(x * s1[None] + b1[None], 0.0).astype(jnp.bfloat16)
    h1 = jnp.einsum('oc,bcl->bol', w1f, h0, preferred_element_type=jnp.float32)
    h1 = jnp.maximum(h1 + b2[None], 0.0).astype(jnp.bfloat16)
    ya = jnp.einsum('oc,bcl->bol', w2s, h1, preferred_element_type=jnp.float32)
    y_m1, y_c, y_p1 = ya[:, :Cg], ya[:, Cg:2 * Cg], ya[:, 2 * Cg:]
    zero = jnp.zeros((B, Cg, 1), jnp.float32)
    y = (y_c
         + jnp.concatenate([zero, y_m1[:, :, :-1]], axis=-1)
         + jnp.concatenate([y_p1[:, :, 1:], zero], axis=-1))
    # SE tail mirrors the kernel: bf16 matmul operands, f32 accumulation.
    pool_vec = jnp.full((L,), jnp.bfloat16(1.0 / L), jnp.bfloat16)
    pooled = jnp.einsum('bcl,l->bc', y.astype(jnp.bfloat16), pool_vec,
                        preferred_element_type=jnp.float32)                     # (B, Cg)
    hid = jnp.maximum(jnp.einsum('rc,bc->br', fc1, pooled.astype(jnp.bfloat16),
                                 preferred_element_type=jnp.float32), 0.0)      # (B, Cr)
    scale = jax.nn.sigmoid(jnp.einsum('cr,br->bc', fc2, hid.astype(jnp.bfloat16),
                                      preferred_element_type=jnp.float32))      # (B, Cg)
    scale = scale.astype(jnp.bfloat16).astype(jnp.float32)   # kernel broadcasts scale as bf16
    return y * scale[:, :, None]


def ref_forward_f32(x, params):
    """Pure-JAX full-f32 reference of the original module math."""
    s1, b1, w1, s2, b2, w2, fc1, fc2 = params
    h0 = jnp.maximum(x * s1[None] + b1[None], 0.0)
    h1 = jnp.einsum('oc,bcl->bol', w1, h0)
    h1 = jnp.maximum(h1 * s2[None] + b2[None], 0.0)
    L = h1.shape[-1]
    h1p = jnp.pad(h1, ((0, 0), (0, 0), (1, 1)))
    y = sum(jnp.einsum('oc,bcl->bol', w2[k], h1p[:, :, k:k + L]) for k in range(3))
    pooled = jnp.mean(y, axis=-1, keepdims=True)
    s = jnp.maximum(jnp.einsum('rc,bcx->brx', fc1, pooled), 0.0)
    s = jax.nn.sigmoid(jnp.einsum('cr,brx->bcx', fc2, s))
    return y * s


def init_params(key, num_input_features, growth_rate, bn_size, reduction=4):
    """Deterministic synthetic parameters (shapes follow the module __init__)."""
    C_in = num_input_features
    C1 = bn_size * growth_rate
    Cg = growth_rate
    Cr = max(Cg // reduction, 1)
    ks = jax.random.split(key, 10)
    eps = 1e-5

    # BatchNorm1d(C_in): gamma, beta, running_mean, running_var -> folded scale/bias.
    g1 = jax.random.uniform(ks[0], (C_in,), jnp.float32, 0.5, 1.5)
    be1 = jax.random.normal(ks[1], (C_in,), jnp.float32) * 0.1
    rm1 = jax.random.normal(ks[2], (C_in,), jnp.float32) * 0.1
    rv1 = jax.random.uniform(ks[3], (C_in,), jnp.float32, 0.5, 1.5)
    s1 = (g1 / jnp.sqrt(rv1 + eps)).reshape(C_in, 1)
    b1 = (be1 - rm1 * g1 / jnp.sqrt(rv1 + eps)).reshape(C_in, 1)

    # Conv1d(C_in, C1, k=1, bias=False): weight (C1, C_in, 1) -> (C1, C_in).
    w1 = jax.random.normal(ks[4], (C1, C_in), jnp.float32) * (1.0 / jnp.sqrt(C_in))

    # BatchNorm1d(C1).
    g2 = jax.random.uniform(ks[5], (C1,), jnp.float32, 0.5, 1.5)
    be2 = jax.random.normal(ks[6], (C1,), jnp.float32) * 0.1
    rm2 = jax.random.normal(ks[7], (C1,), jnp.float32) * 0.1
    rv2 = jax.random.uniform(ks[8], (C1,), jnp.float32, 0.5, 1.5)
    s2 = (g2 / jnp.sqrt(rv2 + eps)).reshape(C1, 1)
    b2 = (be2 - rm2 * g2 / jnp.sqrt(rv2 + eps)).reshape(C1, 1)

    # Conv1d(C1, Cg, k=3, pad=1, bias=False): weight (Cg, C1, 3) -> tap-major (3, Cg, C1).
    k2 = jax.random.split(ks[9], 3)
    w2_nat = jax.random.normal(k2[0], (Cg, C1, 3), jnp.float32) * (1.0 / jnp.sqrt(3 * C1))
    w2 = jnp.transpose(w2_nat, (2, 0, 1))

    # SELayer(Cg, reduction): Linear(Cg, Cr, bias=False), Linear(Cr, Cg, bias=False).
    fc1 = jax.random.normal(k2[1], (Cr, Cg), jnp.float32) * (1.0 / jnp.sqrt(Cg))
    fc2 = jax.random.normal(k2[2], (Cg, Cr), jnp.float32) * (1.0 / jnp.sqrt(Cr))

    return (s1, b1, w1, s2, b2, w2, fc1, fc2)


if __name__ == "__main__":
    # Small shapes consistent with the module: growth_rate=32, bn_size=4,
    # drop_rate=0.0 (dropout identity).
    B, C_in, L = 4, 64, 128
    growth_rate, bn_size = 32, 4

    key = jax.random.PRNGKey(0)
    kx, kp = jax.random.split(key)
    x = jax.random.normal(kx, (B, C_in, L), jnp.float32)
    params = init_params(kp, C_in, growth_rate, bn_size)
    prep = prepare_params(params)

    # Layout-native path: activations stay lane-stacked as (C, B*L).  In a full
    # DenseNet this layout persists across layers, so the relayout below happens
    # once at the network boundary only.
    x2 = jnp.transpose(x, (1, 0, 2)).reshape(C_in, B * L)
    out2 = jax.block_until_ready(dense_layer_forward_stacked(x2, prep, seg_len=L))
    assert out2.shape == (growth_rate, B * L)
    out = jnp.transpose(out2.reshape(growth_rate, B, L), (1, 0, 2))

    # Convenience (B, C, L) wrapper agrees with the layout-native path.
    out_w = jax.block_until_ready(dense_layer_forward(x, params))
    assert out_w.shape == (B, growth_rate, L)
    assert jnp.allclose(out, out_w, atol=1e-6, rtol=1e-6)

    # A multi-step grid (batch_tile=1) matches the fused-tile result.
    out_multi2 = jax.block_until_ready(
        dense_layer_forward_stacked(x2, prep, seg_len=L, batch_tile=1))
    assert jnp.allclose(out2, out_multi2, atol=1e-5, rtol=1e-5)

    # Tight check vs a reference mirroring the kernel's bf16 matmul operands.
    ref_b = jax.block_until_ready(ref_forward_bf16(x, prep))
    assert jnp.allclose(out, ref_b, atol=5e-3, rtol=5e-3), "mismatch vs bf16-matched reference"

    # Loose check vs the full-f32 module reference (validates BN folding /
    # conv2 restructuring / SE vectorization semantics).
    ref_f = jax.block_until_ready(ref_forward_f32(x, params))
    assert jnp.allclose(out, ref_f, atol=5e-2, rtol=5e-2), "mismatch vs f32 module reference"

    print("KERNEL_OK")
</pallas_src>

<mosaic_0001>
module attributes {stable_mosaic.version = 11 : i64} {
  func.func @dense_layer_kernel(%arg0: i32, %arg1: memref<64x512xf32, #tpu.memory_space<vmem>>, %arg2: memref<64x1xf32, #tpu.memory_space<vmem>>, %arg3: memref<64x1xf32, #tpu.memory_space<vmem>>, %arg4: memref<128x64xbf16, #tpu.memory_space<vmem>>, %arg5: memref<128x1xf32, #tpu.memory_space<vmem>>, %arg6: memref<96x128xbf16, #tpu.memory_space<vmem>>, %arg7: memref<1x512xf32, #tpu.memory_space<vmem>>, %arg8: memref<1x512xf32, #tpu.memory_space<vmem>>, %arg9: memref<512x4xbf16, #tpu.memory_space<vmem>>, %arg10: memref<4x512xbf16, #tpu.memory_space<vmem>>, %arg11: memref<8x32xbf16, #tpu.memory_space<vmem>>, %arg12: memref<32x8xbf16, #tpu.memory_space<vmem>>, %arg13: memref<32x512xf32, #tpu.memory_space<vmem>>) attributes {dimension_semantics = [#tpu.dimension_semantics<parallel>], iteration_bounds = array<i64: 1>, scalar_prefetch = 0 : i64, scratch_operands = 0 : i64, tpu.core_type = #tpu.core_type<tc>, window_params = [{transform_indices = @transform_0, window_bounds = array<i64: 64, 512>}, {pipeline_mode = #tpu.pipeline_mode<synchronous>, transform_indices = @transform_1, window_bounds = array<i64: 64, 1>}, {pipeline_mode = #tpu.pipeline_mode<synchronous>, transform_indices = @transform_2, window_bounds = array<i64: 64, 1>}, {pipeline_mode = #tpu.pipeline_mode<synchronous>, transform_indices = @transform_3, window_bounds = array<i64: 128, 64>}, {pipeline_mode = #tpu.pipeline_mode<synchronous>, transform_indices = @transform_4, window_bounds = array<i64: 128, 1>}, {pipeline_mode = #tpu.pipeline_mode<synchronous>, transform_indices = @transform_5, window_bounds = array<i64: 96, 128>}, {pipeline_mode = #tpu.pipeline_mode<synchronous>, transform_indices = @transform_6, window_bounds = array<i64: 1, 512>}, {pipeline_mode = #tpu.pipeline_mode<synchronous>, transform_indices = @transform_7, window_bounds = array<i64: 1, 512>}, {pipeline_mode = #tpu.pipeline_mode<synchronous>, transform_indices = @transform_8, window_bounds = array<i64: 512, 4>}, {pipeline_mode = #tpu.pipeline_mode<synchronous>, transform_indices = @transform_9, window_bounds = array<i64: 4, 512>}, {pipeline_mode = #tpu.pipeline_mode<synchronous>, transform_indices = @transform_10, window_bounds = array<i64: 8, 32>}, {pipeline_mode = #tpu.pipeline_mode<synchronous>, transform_indices = @transform_11, window_bounds = array<i64: 32, 8>}, {transform_indices = @transform_12, window_bounds = array<i64: 32, 512>}]} {
    %c0 = arith.constant 0 : index
    %c0_0 = arith.constant 0 : index
    %0 = vector.load %arg1[%c0, %c0_0] : memref<64x512xf32, #tpu.memory_space<vmem>>, vector<64x512xf32>
    %c0_1 = arith.constant 0 : index
    %c0_2 = arith.constant 0 : index
    %1 = vector.load %arg2[%c0_1, %c0_2] : memref<64x1xf32, #tpu.memory_space<vmem>>, vector<64x1xf32>
    %2 = vector.broadcast %1 : vector<64x1xf32> to vector<64x512xf32>
    %3 = arith.mulf %0, %2 : vector<64x512xf32>
    %c0_3 = arith.constant 0 : index
    %c0_4 = arith.constant 0 : index
    %4 = vector.load %arg3[%c0_3, %c0_4] : memref<64x1xf32, #tpu.memory_space<vmem>>, vector<64x1xf32>
    %5 = vector.broadcast %4 : vector<64x1xf32> to vector<64x512xf32>
    %6 = arith.addf %3, %5 : vector<64x512xf32>
    %cst = arith.constant 0.000000e+00 : f32
    %7 = vector.broadcast %cst : f32 to vector<64x512xf32>
    %8 = arith.maximumf %6, %7 : vector<64x512xf32>
    %9 = arith.truncf %8 : vector<64x512xf32> to vector<64x512xbf16>
    %c0_5 = arith.constant 0 : index
    %c0_6 = arith.constant 0 : index
    %10 = vector.load %arg4[%c0_5, %c0_6] : memref<128x64xbf16, #tpu.memory_space<vmem>>, vector<128x64xbf16>
    %cst_7 = arith.constant dense<0.000000e+00> : vector<128x512xf32>
    %11 = tpu.matmul %10, %9, %cst_7 {dimension_numbers = #tpu.dot_dimension_numbers<[1], [0], [0], [1], [0, 0, 1, 1], [], []>} : vector<128x64xbf16>, vector<64x512xbf16>, vector<128x512xf32> -> vector<128x512xf32>
    %c0_8 = arith.constant 0 : index
    %c0_9 = arith.constant 0 : index
    %12 = vector.load %arg5[%c0_8, %c0_9] : memref<128x1xf32, #tpu.memory_space<vmem>>, vector<128x1xf32>
    %13 = vector.broadcast %12 : vector<128x1xf32> to vector<128x512xf32>
    %14 = arith.addf %11, %13 : vector<128x512xf32>
    %cst_10 = arith.constant 0.000000e+00 : f32
    %15 = vector.broadcast %cst_10 : f32 to vector<128x512xf32>
    %16 = arith.maximumf %14, %15 : vector<128x512xf32>
    %17 = arith.truncf %16 : vector<128x512xf32> to vector<128x512xbf16>
    %c0_11 = arith.constant 0 : index
    %c0_12 = arith.constant 0 : index
    %18 = vector.load %arg6[%c0_11, %c0_12] : memref<96x128xbf16, #tpu.memory_space<vmem>>, vector<96x128xbf16>
    %cst_13 = arith.constant dense<0.000000e+00> : vector<96x512xf32>
    %19 = tpu.matmul %18, %17, %cst_13 {dimension_numbers = #tpu.dot_dimension_numbers<[1], [0], [0], [1], [0, 0, 1, 1], [], []>} : vector<96x128xbf16>, vector<128x512xbf16>, vector<96x512xf32> -> vector<96x512xf32>
    %20 = vector.extract_strided_slice %19 {offsets = [0, 0], sizes = [32, 512], strides = [1, 1]} : vector<96x512xf32> to vector<32x512xf32>
    %21 = vector.extract_strided_slice %19 {offsets = [32, 0], sizes = [32, 512], strides = [1, 1]} : vector<96x512xf32> to vector<32x512xf32>
    %22 = vector.extract_strided_slice %19 {offsets = [64, 0], sizes = [32, 512], strides = [1, 1]} : vector<96x512xf32> to vector<32x512xf32>
    %c0_14 = arith.constant 0 : index
    %c0_15 = arith.constant 0 : index
    %23 = vector.load %arg7[%c0_14, %c0_15] : memref<1x512xf32, #tpu.memory_space<vmem>>, vector<1x512xf32>
    %c1_i32 = arith.constant 1 : i32
    %24 = tpu.dynamic_rotate %20 by %c1_i32 dim 1 : vector<32x512xf32>, i32 -> vector<32x512xf32>
    %25 = vector.broadcast %23 : vector<1x512xf32> to vector<32x512xf32>
    %26 = arith.mulf %25, %24 : vector<32x512xf32>
    %27 = arith.addf %21, %26 : vector<32x512xf32>
    %c0_16 = arith.constant 0 : index
    %c0_17 = arith.constant 0 : index
    %28 = vector.load %arg8[%c0_16, %c0_17] : memref<1x512xf32, #tpu.memory_space<vmem>>, vector<1x512xf32>
    %c511_i32 = arith.constant 511 : i32
    %29 = tpu.dynamic_rotate %22 by %c511_i32 dim 1 : vector<32x512xf32>, i32 -> vector<32x512xf32>
    %30 = vector.broadcast %28 : vector<1x512xf32> to vector<32x512xf32>
    %31 = arith.mulf %30, %29 : vector<32x512xf32>
    %32 = arith.addf %27, %31 : vector<32x512xf32>
    %33 = arith.truncf %32 : vector<32x512xf32> to vector<32x512xbf16>
    %c0_18 = arith.constant 0 : index
    %c0_19 = arith.constant 0 : index
    %34 = vector.load %arg9[%c0_18, %c0_19] : memref<512x4xbf16, #tpu.memory_space<vmem>>, vector<512x4xbf16>
    %cst_20 = arith.constant dense<0.000000e+00> : vector<32x4xf32>
    %35 = tpu.matmul %33, %34, %cst_20 {dimension_numbers = #tpu.dot_dimension_numbers<[1], [0], [0], [1], [0, 0, 1, 1], [], []>} : vector<32x512xbf16>, vector<512x4xbf16>, vector<32x4xf32> -> vector<32x4xf32>
    %c0_21 = arith.constant 0 : index
    %c0_22 = arith.constant 0 : index
    %36 = vector.load %arg11[%c0_21, %c0_22] : memref<8x32xbf16, #tpu.memory_space<vmem>>, vector<8x32xbf16>
    %37 = arith.truncf %35 : vector<32x4xf32> to vector<32x4xbf16>
    %cst_23 = arith.constant dense<0.000000e+00> : vector<8x4xf32>
    %38 = tpu.matmul %36, %37, %cst_23 {dimension_numbers = #tpu.dot_dimension_numbers<[1], [0], [0], [1], [0, 0, 1, 1], [], []>} : vector<8x32xbf16>, vector<32x4xbf16>, vector<8x4xf32> -> vector<8x4xf32>
    %cst_24 = arith.constant 0.000000e+00 : f32
    %39 = vector.broadcast %cst_24 : f32 to vector<8x4xf32>
    %40 = arith.maximumf %38, %39 : vector<8x4xf32>
    %c0_25 = arith.constant 0 : index
    %c0_26 = arith.constant 0 : index
    %41 = vector.load %arg12[%c0_25, %c0_26] : memref<32x8xbf16, #tpu.memory_space<vmem>>, vector<32x8xbf16>
    %42 = arith.truncf %40 : vector<8x4xf32> to vector<8x4xbf16>
    %cst_27 = arith.constant dense<0.000000e+00> : vector<32x4xf32>
    %43 = tpu.matmul %41, %42, %cst_27 {dimension_numbers = #tpu.dot_dimension_numbers<[1], [0], [0], [1], [0, 0, 1, 1], [], []>} : vector<32x8xbf16>, vector<8x4xbf16>, vector<32x4xf32> -> vector<32x4xf32>
    %44 = arith.negf %43 : vector<32x4xf32>
    %45 = math.exp %44 : vector<32x4xf32>
    %cst_28 = arith.constant 1.000000e+00 : f32
    %46 = vector.broadcast %cst_28 : f32 to vector<32x4xf32>
    %47 = arith.addf %46, %45 : vector<32x4xf32>
    %48 = arith.divf %46, %47 : vector<32x4xf32>
    %49 = arith.truncf %48 : vector<32x4xf32> to vector<32x4xbf16>
    %c0_29 = arith.constant 0 : index
    %c0_30 = arith.constant 0 : index
    %50 = vector.load %arg10[%c0_29, %c0_30] : memref<4x512xbf16, #tpu.memory_space<vmem>>, vector<4x512xbf16>
    %cst_31 = arith.constant dense<0.000000e+00> : vector<32x512xf32>
    %51 = tpu.matmul %49, %50, %cst_31 {dimension_numbers = #tpu.dot_dimension_numbers<[1], [0], [0], [1], [0, 0, 1, 1], [], []>} : vector<32x4xbf16>, vector<4x512xbf16>, vector<32x512xf32> -> vector<32x512xf32>
    %52 = arith.mulf %32, %51 : vector<32x512xf32>
    %c0_32 = arith.constant 0 : index
    %c0_33 = arith.constant 0 : index
    %53 = vector.load %arg13[%c0_32, %c0_33] : memref<32x512xf32, #tpu.memory_space<vmem>>, vector<32x512xf32>
    tpu.vector_store %arg13[%c0_32, %c0_33], %52 {strides = array<i32>} : memref<32x512xf32, #tpu.memory_space<vmem>>, vector<32x512xf32>,
    return
  }
  func.func @transform_0(%arg0: i32) -> (i32, i32) {
    %c0_i32 = arith.constant 0 : i32
    %c0_i32_0 = arith.constant 0 : i32
    return %c0_i32, %arg0 : i32, i32
  }
  func.func @transform_1(%arg0: i32) -> (i32, i32) {
    %c0_i32 = arith.constant 0 : i32
    %c0_i32_0 = arith.constant 0 : i32
    %c0_i32_1 = arith.constant 0 : i32
    return %c0_i32, %c0_i32_0 : i32, i32
  }
  func.func @transform_2(%arg0: i32) -> (i32, i32) {
    %c0_i32 = arith.constant 0 : i32
    %c0_i32_0 = arith.constant 0 : i32
    %c0_i32_1 = arith.constant 0 : i32
    return %c0_i32, %c0_i32_0 : i32, i32
  }
  func.func @transform_3(%arg0: i32) -> (i32, i32) {
    %c0_i32 = arith.constant 0 : i32
    %c0_i32_0 = arith.constant 0 : i32
    %c0_i32_1 = arith.constant 0 : i32
    return %c0_i32, %c0_i32_0 : i32, i32
  }
  func.func @transform_4(%arg0: i32) -> (i32, i32) {
    %c0_i32 = arith.constant 0 : i32
    %c0_i32_0 = arith.constant 0 : i32
    %c0_i32_1 = arith.constant 0 : i32
    return %c0_i32, %c0_i32_0 : i32, i32
  }
  func.func @transform_5(%arg0: i32) -> (i32, i32) {
    %c0_i32 = arith.constant 0 : i32
    %c0_i32_0 = arith.constant 0 : i32
    %c0_i32_1 = arith.constant 0 : i32
    return %c0_i32, %c0_i32_0 : i32, i32
  }
  func.func @transform_6(%arg0: i32) -> (i32, i32) {
    %c0_i32 = arith.constant 0 : i32
    %c0_i32_0 = arith.constant 0 : i32
    %c0_i32_1 = arith.constant 0 : i32
    return %c0_i32, %c0_i32_0 : i32, i32
  }
  func.func @transform_7(%arg0: i32) -> (i32, i32) {
    %c0_i32 = arith.constant 0 : i32
    %c0_i32_0 = arith.constant 0 : i32
    %c0_i32_1 = arith.constant 0 : i32
    return %c0_i32, %c0_i32_0 : i32, i32
  }
  func.func @transform_8(%arg0: i32) -> (i32, i32) {
    %c0_i32 = arith.constant 0 : i32
    %c0_i32_0 = arith.constant 0 : i32
    %c0_i32_1 = arith.constant 0 : i32
    return %c0_i32, %c0_i32_0 : i32, i32
  }
  func.func @transform_9(%arg0: i32) -> (i32, i32) {
    %c0_i32 = arith.constant 0 : i32
    %c0_i32_0 = arith.constant 0 : i32
    %c0_i32_1 = arith.constant 0 : i32
    return %c0_i32, %c0_i32_0 : i32, i32
  }
  func.func @transform_10(%arg0: i32) -> (i32, i32) {
    %c0_i32 = arith.constant 0 : i32
    %c0_i32_0 = arith.constant 0 : i32
    %c0_i32_1 = arith.constant 0 : i32
    return %c0_i32, %c0_i32_0 : i32, i32
  }
  func.func @transform_11(%arg0: i32) -> (i32, i32) {
    %c0_i32 = arith.constant 0 : i32
    %c0_i32_0 = arith.constant 0 : i32
    %c0_i32_1 = arith.constant 0 : i32
    return %c0_i32, %c0_i32_0 : i32, i32
  }
  func.func @transform_12(%arg0: i32) -> (i32, i32) {
    %c0_i32 = arith.constant 0 : i32
    %c0_i32_0 = arith.constant 0 : i32
    return %c0_i32, %arg0 : i32, i32
  }
}

</mosaic_0001>

<bundles_post_ra>
// kernel: tpu_custom_call.1
= control target key start
LH: loop header
LB: loop body
LE: loop exit
PB: predicated region body
PF: predicated region fallthrough
CT: control target
= control target key end

     0   :  { %v2115_v3 = vmov 0   ;;  %s3198_s0 = inlined_call_operand.vmem [shape: f32[64,512], index: 0, kind: input, shape index: {}]   ;;  %s3199_s1 = inlined_call_operand.vmem [shape: f32[64,1], index: 1, kind: input, shape index: {}]   ;;  %s3200_s2 = inlined_call_operand.vmem [shape: f32[64,1], index: 2, kind: input, shape index: {}]   ;;  %s3201_s3 = inlined_call_operand.vmem [shape: bf16[128,64], index: 3, kind: input, shape index: {}]   ;;  %s3202_s4 = inlined_call_operand.vmem [shape: f32[128,1], index: 4, kind: input, shape index: {}]   ;;  %s3203_s5 = inlined_call_operand.vmem [shape: bf16[96,128], index: 5, kind: input, shape index: {}]   ;;  %s3204_s6 = inlined_call_operand.vmem [shape: f32[1,512], index: 6, kind: input, shape index: {}]   ;;  %s3205_s7 = inlined_call_operand.vmem [shape: f32[1,512], index: 7, kind: input, shape index: {}]   ;;  %s3206_s8 = inlined_call_operand.vmem [shape: bf16[512,4], index: 8, kind: input, shape index: {}]   ;;  %s3207_s9 = inlined_call_operand.vmem [shape: bf16[4,512], index: 9, kind: input, shape index: {}]   ;;  %s3208_s10 = inlined_call_operand.vmem [shape: bf16[8,32], index: 10, kind: input, shape index: {}]   ;;  %s3209_s11 = inlined_call_operand.vmem [shape: bf16[32,8], index: 11, kind: input, shape index: {}]   ;;  %s3210_s12 = inlined_call_operand.hbm [shape: f32[32,512], index: 12, kind: output, shape index: {}]  }
   0x1   :  { %v161_v0 = vld [vmem:[%s3200_s2 + $0x30] sm:$0xff]  ;;  %v79_v2 = vld [vmem:[%s3199_s1 + $0x20] sm:$0xff]  ;;  %2072 = vset.pattern.permute.xlu2 %v2115_v3  ;;  %2071 = vset.pattern.permute.xlu1 %v2115_v3 }
   0x2   :  { %v81_v1 = vld [vmem:[%s3199_s1 + $0x30] sm:$0xff]  ;;  %2070 = vset.pattern.permute.xlu0 %v2115_v3  ;;  %195 = vperm.xlu1 %2071, %v161_v0  }
   0x3   :  { %115 = vperm.xlu0 %2070, %v81_v1   ;;  %105 = vperm.xlu2 %2072, %v79_v2  }
   0x4   :  { %17 = vsyncpa [#allocation3], 0  ;;  %v162_v4 = vld [vmem:[%s3200_s2 + $0x38] sm:$0xff]  ;;  %v80_v6 = vld [vmem:[%s3199_s1 + $0x28] sm:$0xff]  ;;  %vm435_vm0 = vcmask 523264   ;;  %s2116_s14 = smov 1  }
   0x5   :  { %v82_v5 = vld [vmem:[%s3199_s1 + $0x38] sm:$0xff]  ;;  %v160_v7 = vld [vmem:[%s3200_s2 + $0x28] sm:$0xff]  ;;  %v159_v8 = vld [vmem:[%s3200_s2 + $0x20] sm:$0xff]  ;;  %vm1483_vm3 = vcmask 261120   ;;  %vm1523_vm4 = vcmask 1043456   ;;  %vm1516_vm5 = vcmask 64512  }
   0x6   :  { %v77_v9 = vld [vmem:[%s3199_s1 + $0x10] sm:$0xff]  ;;  %v78_v11 = vld [vmem:[%s3199_s1 + $0x18] sm:$0xff]  ;;  %v76_v13 = vld [vmem:[%s3199_s1 + $0x8] sm:$0xff]  ;;  %vm1638_vm6 = vcmask 1041408   ;;  %vm1631_vm15 = vcmask 31744   ;;  %s2119_s15 = smov 512  }
   0x7   :  { %v157_v10 = vld [vmem:[%s3200_s2 + $0x10] sm:$0xff]  ;;  %v158_v12 = vld [vmem:[%s3200_s2 + $0x18] sm:$0xff]  ;;  %v155_v14 = vld [vmem:[%s3200_s2] sm:$0xff] }
   0x8   :  { %v75_v15 = vld [vmem:[%s3199_s1] sm:$0xff]  ;;  %v313_v16 = vld [vmem:[%s3202_s4 + $0x70] sm:$0xff]  ;;  %v314_v17 = vld [vmem:[%s3202_s4 + $0x78] sm:$0xff] }
   0x9   :  { %v156_v18 = vld [vmem:[%s3200_s2 + $0x8] sm:$0xff]  ;;  %v309_v20 = vld [vmem:[%s3202_s4 + $0x50] sm:$0xff]  ;;  %v311_v21 = vld [vmem:[%s3202_s4 + $0x60] sm:$0xff] }
   0xa   :  { %200 = vperm.xlu1 %2071, %v162_v4   ;;  %v312_v19 = vld [vmem:[%s3202_s4 + $0x68] sm:$0xff]  ;;  %v307_v22 = vld [vmem:[%s3202_s4 + $0x40] sm:$0xff]  ;;  %v310_v24 = vld [vmem:[%s3202_s4 + $0x58] sm:$0xff] }
   0xb   :  { %120 = vperm.xlu0 %2070, %v82_v5   ;;  %110 = vperm.xlu2 %2072, %v80_v6   ;;  %v308_v23 = vld [vmem:[%s3202_s4 + $0x48] sm:$0xff]  ;;  %v306_v25 = vld [vmem:[%s3202_s4 + $0x38] sm:$0xff]  ;;  %v303_v26 = vld [vmem:[%s3202_s4 + $0x20] sm:$0xff] }
   0xc   :  { %v305_v27 = vld [vmem:[%s3202_s4 + $0x30] sm:$0xff]  ;;  %v302_v29 = vld [vmem:[%s3202_s4 + $0x18] sm:$0xff]  ;;  %v304_v30 = vld [vmem:[%s3202_s4 + $0x28] sm:$0xff] }
   0xd   :  { %v301_v28 = vld [vmem:[%s3202_s4 + $0x10] sm:$0xff]  ;;  %v300_v31 = vld [vmem:[%s3202_s4 + $0x8] sm:$0xff]  ;;  %v299_v32 = vld [vmem:[%s3202_s4] sm:$0xff]  ;;  %s1761_s4 = sshll.u32 %s3210_s12, 4  ;;  %s1762_s4 = int_to_ptr.hbm [resolvable:$true] %s1761_s4 }
   0xe   :  { %v68_v36 = vld [vmem:[%s3198_s0 + $0xc8] sm:$0xff]  ;;  %v67_v37 = vld [vmem:[%s3198_s0 + $0xc0] sm:$0xff]  ;;  %v70_v38 = vld [vmem:[%s3198_s0 + $0xd8] sm:$0xff] }
   0xf   :  { %v72_v43 = vld [vmem:[%s3198_s0 + $0xe8] sm:$0xff]  ;;  %v71_v44 = vld [vmem:[%s3198_s0 + $0xe0] sm:$0xff]  ;;  %v74_v45 = vld [vmem:[%s3198_s0 + $0xf8] sm:$0xff] }
  0x10   :  { %v59_v50 = vld [vmem:[%s3198_s0 + $0x80] sm:$0xff]  ;;  %v60_v55 = vld [vmem:[%s3198_s0 + $0x88] sm:$0xff]  ;;  %v66_v58 = vld [vmem:[%s3198_s0 + $0xb8] sm:$0xff] }
  0x11   :  { %v63_v56 = vld [vmem:[%s3198_s0 + $0xa0] sm:$0xff]  ;;  %v64_v57 = vld [vmem:[%s3198_s0 + $0xa8] sm:$0xff]  ;;  %v62_v62 = vld [vmem:[%s3198_s0 + $0x98] sm:$0xff] }
  0x12   :  { %190 = vperm.xlu1 %2071, %v160_v7  }
  0x13   :  { %185 = vperm.xlu0 %2070, %v159_v8   ;;  %95 = vperm.xlu2 %2072, %v77_v9  }
  0x1a   :  { %175 = vperm.xlu1 %2071, %v157_v10  }
  0x1b   :  { %100 = vperm.xlu0 %2070, %v78_v11   ;;  %180 = vperm.xlu2 %2072, %v158_v12  }
  0x22   :  { %90 = vperm.xlu1 %2071, %v76_v13  }
  0x23   :  { %165 = vperm.xlu2 %2072, %v155_v14   ;;  %85 = vperm.xlu0 %2070, %v75_v15  }
  0x2a   :  { %387 = vperm.xlu1 %2071, %v313_v16  }
  0x2b   :  { %392 = vperm.xlu2 %2072, %v314_v17   ;;  %170 = vperm.xlu0 %2070, %v156_v18  }
  0x32   :  { %382 = vperm.xlu1 %2071, %v312_v19  }
  0x33   :  { %367 = vperm.xlu2 %2072, %v309_v20   ;;  %377 = vperm.xlu0 %2070, %v311_v21  }
  0x3a   :  { %357 = vperm.xlu1 %2071, %v307_v22  }
  0x3b   :  { %362 = vperm.xlu2 %2072, %v308_v23   ;;  %372 = vperm.xlu0 %2070, %v310_v24  }
  0x42   :  { %352 = vperm.xlu1 %2071, %v306_v25  }
  0x43   :  { %337 = vperm.xlu2 %2072, %v303_v26   ;;  %347 = vperm.xlu0 %2070, %v305_v27   ;;  %v51_v26 = vld [vmem:[%s3198_s0 + $0x40] sm:$0xff]  ;;  %v52_v27 = vld [vmem:[%s3198_s0 + $0x48] sm:$0xff] }
  0x4a   :  { %327 = vperm.xlu1 %2071, %v301_v28  }
  0x4b   :  { %332 = vperm.xlu2 %2072, %v302_v29   ;;  %342 = vperm.xlu0 %2070, %v304_v30  }
  0x52   :  { %322 = vperm.xlu1 %2071, %v300_v31   ;;  %v54_v31 = vld [vmem:[%s3198_s0 + $0x58] sm:$0xff] }
  0x53   :  { %317 = vperm.xlu0 %2070, %v299_v32  }
  0x5d   :  { %v2282_v33 = vpop.permute.xlu2 %105 }
  0x5e   :  { %v139_v63 = vmul.f32 %v2282_v33, %v59_v50  ;;  %v140_v6 = vmul.f32 %v2282_v33, %v60_v55  ;;  %v142_v10 = vmul.f32 %v2282_v33, %v62_v62 }
  0x65   :  { %v2300_v42 = vpop.permute.xlu2 %110 }
  0x66   :  { %v143_v7 = vmul.f32 %v2300_v42, %v63_v56  ;;  %v144_v8 = vmul.f32 %v2300_v42, %v64_v57  ;;  %v146_v9 = vmul.f32 %v2300_v42, %v66_v58 }
  0x6d   :  { %v2350_v15 = vpop.permute.xlu2 %95 }
  0x74   :  { %v2284_v34 = vpop.permute.xlu1 %195 }
  0x75   :  { %v2286_v35 = vpop.permute.xlu0 %115  ;;  %v2386_v55 = vpop.permute.xlu2 %180 }
  0x76   :  { %v148_v39 = vmul.f32 %v2286_v35, %v68_v36  ;;  %v147_v40 = vmul.f32 %v2286_v35, %v67_v37  ;;  %v150_v41 = vmul.f32 %v2286_v35, %v70_v38  ;;  %v131_v38 = vmul.f32 %v2350_v15, %v51_v26 }
  0x78   :  { %v227_v48 = vadd.f32 %v2284_v34, %v147_v40  ;;  %v228_v49 = vadd.f32 %v2284_v34, %v148_v39  ;;  %v230_v54 = vadd.f32 %v2284_v34, %v150_v41  ;;  %v132_v39 = vmul.f32 %v2350_v15, %v52_v27  ;;  %v55_v40 = vld [vmem:[%s3198_s0 + $0x60] sm:$0xff]  ;;  %v56_v41 = vld [vmem:[%s3198_s0 + $0x68] sm:$0xff]  ;;  %v57_v27 = vld [vmem:[%s3198_s0 + $0x70] sm:$0xff] }
  0x7a   :  { %v259_v0 = vmax.f32 %v227_v48, 0.0  ;;  %v260_v1 = vmax.f32 %v228_v49, 0.0  ;;  %v262_v4 = vmax.f32 %v230_v54, 0.0 }
  0x7c   :  { %v2311_v46 = vpop.permute.xlu1 %200 }
  0x7d   :  { %v2313_v47 = vpop.permute.xlu0 %120 }
  0x7e   :  { %v152_v51 = vmul.f32 %v2313_v47, %v72_v43  ;;  %v151_v52 = vmul.f32 %v2313_v47, %v71_v44  ;;  %v154_v53 = vmul.f32 %v2313_v47, %v74_v45  ;;  %v58_v43 = vld [vmem:[%s3198_s0 + $0x78] sm:$0xff]  ;;  %v134_v44 = vmul.f32 %v2350_v15, %v54_v31 }
  0x80   :  { %v231_v59 = vadd.f32 %v2311_v46, %v151_v52  ;;  %v232_v60 = vadd.f32 %v2311_v46, %v152_v51  ;;  %v234_v61 = vadd.f32 %v2311_v46, %v154_v53 }
  0x82   :  { %v263_v2 = vmax.f32 %v231_v59, 0.0  ;;  %v264_v3 = vmax.f32 %v232_v60, 0.0  ;;  %v266_v5 = vmax.f32 %v234_v61, 0.0  ;;  %v73_v61 = vld [vmem:[%s3198_s0 + $0xf0] sm:$0xff] }
  0x84   :  { %v2348_v11 = vpop.permute.xlu1 %190  ;;  %v279_v12 = vpack.c.bf16 %v263_v2, %v259_v0  ;;  %v280_v13 = vpack.c.bf16 %v264_v3, %v260_v1  ;;  %v282_v14 = vpack.c.bf16 %v266_v5, %v262_v4  ;;  %v43_v2 = vld [vmem:[%s3198_s0] sm:$0xff]  ;;  %v44_v3 = vld [vmem:[%s3198_s0 + $0x8] sm:$0xff] }
  0x85   :  { %v2352_v16 = vpop.permute.xlu0 %185  ;;  %v223_v17 = vadd.f32 %v2348_v11, %v143_v7  ;;  %v224_v18 = vadd.f32 %v2348_v11, %v144_v8  ;;  %v226_v19 = vadd.f32 %v2348_v11, %v146_v9  ;;  %v153_v7 = vmul.f32 %v2313_v47, %v73_v61  ;;  %v46_v9 = vld [vmem:[%s3198_s0 + $0x18] sm:$0xff]  ;;  %v65_v47 = vld [vmem:[%s3198_s0 + $0xb0] sm:$0xff] }
  0x86   :  { %464 = vmatpush.bf16.msra.mxu0 %v279_v12  ;;  %513 = vmatpush.bf16.msra.mxu1 %v280_v13  ;;  %v219_v20 = vadd.f32 %v2352_v16, %v139_v63  ;;  %v220_v21 = vadd.f32 %v2352_v16, %v140_v6  ;;  %v222_v22 = vadd.f32 %v2352_v16, %v142_v10  ;;  %v69_v10 = vld [vmem:[%s3198_s0 + $0xd0] sm:$0xff] }
  0x87   :  { %2060 = vmatpush.bf16.msra.mxu2 %v280_v13  ;;  %611 = vmatpush.bf16.msra.mxu3 %v282_v14  ;;  %v255_v23 = vmax.f32 %v223_v17, 0.0  ;;  %v256_v24 = vmax.f32 %v224_v18, 0.0  ;;  %v258_v25 = vmax.f32 %v226_v19, 0.0  ;;  %v149_v17 = vmul.f32 %v2286_v35, %v69_v10  ;;  %v47_v19 = vld [vmem:[%s3198_s0 + $0x20] sm:$0xff]  ;;  %v166_v35 = vpop.permute.xlu2 %165  ;;  %v2014_v10 = vld [vmem:[%s3201_s3 + $0x10] sm:$0xff] }
  0x88   :  { %v251_v28 = vmax.f32 %v219_v20, 0.0  ;;  %v252_v29 = vmax.f32 %v220_v21, 0.0  ;;  %v254_v30 = vmax.f32 %v222_v22, 0.0  ;;  %v48_v20 = vld [vmem:[%s3198_s0 + $0x28] sm:$0xff]  ;;  %v50_v21 = vld [vmem:[%s3198_s0 + $0x38] sm:$0xff]  ;;  %v233_v22 = vadd.f32 %v2311_v46, %v153_v7 }
  0x8a   :  { %v275_v32 = vpack.c.bf16 %v255_v23, %v251_v28  ;;  %v276_v36 = vpack.c.bf16 %v256_v24, %v252_v29  ;;  %v278_v37 = vpack.c.bf16 %v258_v25, %v254_v30  ;;  %v61_v23 = vld [vmem:[%s3198_s0 + $0x90] sm:$0xff]  ;;  %v145_v24 = vmul.f32 %v2300_v42, %v65_v47  ;;  %v2017_v47 = vld [vmem:[%s3201_s3 + $0x28] sm:$0xff] }
  0x8c   :  { %465 = vmatpush.bf16.msra.mxu0 %v275_v32  ;;  %514 = vmatpush.bf16.msra.mxu1 %v276_v36  ;;  %v2381_v45 = vpop.permute.xlu1 %175  ;;  %v141_v32 = vmul.f32 %v2282_v33, %v61_v23  ;;  %v225_v42 = vadd.f32 %v2348_v11, %v145_v24  ;;  %v49_v11 = vld [vmem:[%s3198_s0 + $0x30] sm:$0xff] }
  0x8d   :  { %2061 = vmatpush.bf16.msra.mxu2 %v276_v36  ;;  %612 = vmatpush.bf16.msra.mxu3 %v278_v37  ;;  %v101_v48 = vpop.permute.xlu0 %100  ;;  %v211_v49 = vadd.f32 %v2381_v45, %v131_v38  ;;  %v212_v50 = vadd.f32 %v2381_v45, %v132_v39  ;;  %v214_v54 = vadd.f32 %v2381_v45, %v134_v44  ;;  %v265_v37 = vmax.f32 %v233_v22, 0.0 }
  0x8e   :  { %v135_v51 = vmul.f32 %v101_v48, %v55_v40  ;;  %v136_v52 = vmul.f32 %v101_v48, %v56_v41  ;;  %v138_v53 = vmul.f32 %v101_v48, %v58_v43  ;;  %v229_v36 = vadd.f32 %v2284_v34, %v149_v17 }
  0x8f   :  { %v243_v59 = vmax.f32 %v211_v49, 0.0  ;;  %v244_v60 = vmax.f32 %v212_v50, 0.0  ;;  %v246_v0 = vmax.f32 %v214_v54, 0.0  ;;  %v137_v41 = vmul.f32 %v101_v48, %v57_v27  ;;  %v53_v50 = vld [vmem:[%s3198_s0 + $0x50] sm:$0xff] }
  0x90   :  { %v215_v56 = vadd.f32 %v2386_v55, %v135_v51  ;;  %v216_v57 = vadd.f32 %v2386_v55, %v136_v52  ;;  %v218_v58 = vadd.f32 %v2386_v55, %v138_v53  ;;  %v221_v49 = vadd.f32 %v2352_v16, %v141_v32  ;;  %v45_v16 = vld [vmem:[%s3198_s0 + $0x10] sm:$0xff] }
  0x91   :  { %v261_v34 = vmax.f32 %v229_v36, 0.0  ;;  %v257_v61 = vmax.f32 %v225_v42, 0.0 }
  0x92   :  { %v247_v62 = vmax.f32 %v215_v56, 0.0  ;;  %v248_v63 = vmax.f32 %v216_v57, 0.0  ;;  %v250_v1 = vmax.f32 %v218_v58, 0.0  ;;  %v133_v58 = vmul.f32 %v2350_v15, %v53_v50  ;;  %v2019_v15 = vld [vmem:[%s3201_s3 + $0x38] sm:$0xff] }
  0x93   :  { %v281_v48 = vpack.c.bf16 %v265_v37, %v261_v34 }
  0x94   :  { %v271_v4 = vpack.c.bf16 %v247_v62, %v243_v59  ;;  %v272_v5 = vpack.c.bf16 %v248_v63, %v244_v60  ;;  %v274_v6 = vpack.c.bf16 %v250_v1, %v246_v0  ;;  %v91_v18 = vpop.permute.xlu1 %90  ;;  %v2012_v59 = vld [vmem:[%s3201_s3] sm:$0xff]  ;;  %v253_v60 = vmax.f32 %v221_v49, 0.0 }
  0x95   :  { %v2401_v8 = vpop.permute.xlu0 %85  ;;  %v127_v28 = vmul.f32 %v91_v18, %v47_v19  ;;  %v128_v29 = vmul.f32 %v91_v18, %v48_v20  ;;  %v130_v30 = vmul.f32 %v91_v18, %v50_v21  ;;  %v217_v62 = vadd.f32 %v2386_v55, %v137_v41 }
  0x96   :  { %466 = vmatpush.bf16.msra.mxu0 %v271_v4  ;;  %v123_v12 = vmul.f32 %v2401_v8, %v43_v2  ;;  %v124_v13 = vmul.f32 %v2401_v8, %v44_v3  ;;  %515 = vmatpush.bf16.msra.mxu1 %v272_v5  ;;  %v126_v14 = vmul.f32 %v2401_v8, %v46_v9 }
  0x97   :  { %2062 = vmatpush.bf16.msra.mxu2 %v272_v5  ;;  %613 = vmatpush.bf16.msra.mxu3 %v274_v6  ;;  %v129_v63 = vmul.f32 %v91_v18, %v49_v11  ;;  %v125_v0 = vmul.f32 %v2401_v8, %v45_v16  ;;  %v213_v1 = vadd.f32 %v2381_v45, %v133_v58  ;;  %v249_v3 = vmax.f32 %v217_v62, 0.0  ;;  %v2013_v45 = vld [vmem:[%s3201_s3 + $0x8] sm:$0xff] }
  0x98   :  { %v203_v25 = vadd.f32 %v166_v35, %v123_v12  ;;  %v204_v26 = vadd.f32 %v166_v35, %v124_v13  ;;  %v206_v31 = vadd.f32 %v166_v35, %v126_v14  ;;  %v277_v2 = vpack.c.bf16 %v257_v61, %v253_v60  ;;  %v2015_v12 = vld [vmem:[%s3201_s3 + $0x18] sm:$0xff]  ;;  %v2016_v13 = vld [vmem:[%s3201_s3 + $0x20] sm:$0xff]  ;;  %v2018_v14 = vld [vmem:[%s3201_s3 + $0x30] sm:$0xff] }
  0x99   :  { %v245_v55 = vmax.f32 %v213_v1, 0.0  ;;  %v205_v5 = vadd.f32 %v166_v35, %v125_v0  ;;  %v2518_v35 = vpop.permute.xlu2 %392 }
  0x9a   :  { %v235_v43 = vmax.f32 %v203_v25, 0.0  ;;  %v236_v44 = vmax.f32 %v204_v26, 0.0  ;;  %v238_v52 = vmax.f32 %v206_v31, 0.0 }
  0x9b   :  { %v273_v6 = vpack.c.bf16 %v249_v3, %v245_v55  ;;  %v237_v8 = vmax.f32 %v205_v5, 0.0 }
  0x9c   :  { %v2516_v23 = vpop.permute.xlu1 %387 }
  0x9d   :  { %v171_v46 = vpop.permute.xlu0 %170 }
  0x9e   :  { %v207_v38 = vadd.f32 %v171_v46, %v127_v28  ;;  %v208_v39 = vadd.f32 %v171_v46, %v128_v29  ;;  %v210_v40 = vadd.f32 %v171_v46, %v130_v30  ;;  %v209_v4 = vadd.f32 %v171_v46, %v129_v63 }
  0xa0   :  { %v239_v51 = vmax.f32 %v207_v38, 0.0  ;;  %v240_v33 = vmax.f32 %v208_v39, 0.0  ;;  %v242_v53 = vmax.f32 %v210_v40, 0.0  ;;  %v241_v7 = vmax.f32 %v209_v4, 0.0 }
  0xa1   :  { %v2586_v4 = vpop.permute.xlu2 %367 }
  0xa2   :  { %v267_v54 = vpack.c.bf16 %v239_v51, %v235_v43  ;;  %v268_v56 = vpack.c.bf16 %v240_v33, %v236_v44  ;;  %v270_v57 = vpack.c.bf16 %v242_v53, %v238_v52  ;;  %v269_v9 = vpack.c.bf16 %v241_v7, %v237_v8 }
  0xa4   :  { %467 = vmatpush.bf16.msra.mxu0 %v267_v54  ;;  %516 = vmatpush.bf16.msra.mxu1 %v268_v56 }
  0xa5   :  { %2063 = vmatpush.bf16.msra.mxu2 %v268_v56  ;;  %614 = vmatpush.bf16.msra.mxu3 %v270_v57  ;;  %v2584_v3 = vpop.permute.xlu0 %377 }
  0xa7   :  { %1805 = vmatmul.msk.bf16.vlgmr.msra.gmra.mxu0 %vm435_vm0, %v2012_v59  ;;  %1813 = vmatmul.msk.bf16.vlgmr.msra.gmra.mxu1 %vm435_vm0, %v2012_v59 }
  0xa8   :  { %1820 = vmatmul.msk.bf16.vlgmr.msra.gmra.mxu2 %vm435_vm0, %v2019_v15  ;;  %1829 = vmatmul.msk.bf16.vlgmr.msra.gmra.mxu3 %vm435_vm0, %v2012_v59 }
  0xa9   :  { %562 = vmatpush.bf16.msrb.mxu2 %v281_v48 }
  0xad   :  { %563 = vmatpush.bf16.msrb.mxu2 %v277_v2  ;;  %v2582_v2 = vpop.permute.xlu1 %382 }
  0xb1   :  { %564 = vmatpush.bf16.msrb.mxu2 %v273_v6 }
  0xb5   :  { %565 = vmatpush.bf16.msrb.mxu2 %v269_v9  ;;  %v2594_v8 = vpop.permute.xlu1 %357  ;;  %v2596_v9 = vpop.permute.xlu0 %372 }
  0xb7   :  { %1806 = vmatmul.msk.bf16.gmra.mxu0 %vm435_vm0, %v2013_v45  ;;  %1814 = vmatmul.msk.bf16.gmra.mxu1 %vm435_vm0, %v2013_v45 }
  0xb8   :  { %1821 = vmatmul.msk.bf16.vlgmr.msrb.gmra.mxu2 %vm435_vm0, %v2012_v59  ;;  %1830 = vmatmul.msk.bf16.gmra.mxu3 %vm435_vm0, %v2013_v45 }
  0xc7   :  { %1807 = vmatmul.msk.bf16.gmra.mxu0 %vm435_vm0, %v2014_v10  ;;  %1815 = vmatmul.msk.bf16.gmra.mxu1 %vm435_vm0, %v2014_v10 }
  0xc8   :  { %1822 = vmatmul.msk.bf16.gmra.mxu2 %vm435_vm0, %v2013_v45  ;;  %1831 = vmatmul.msk.bf16.gmra.mxu3 %vm435_vm0, %v2014_v10 }
  0xd7   :  { %1808 = vmatmul.msk.bf16.gmra.mxu0 %vm435_vm0, %v2015_v12  ;;  %1816 = vmatmul.msk.bf16.gmra.mxu1 %vm435_vm0, %v2015_v12 }
  0xd8   :  { %1823 = vmatmul.msk.bf16.gmra.mxu2 %vm435_vm0, %v2014_v10  ;;  %1832 = vmatmul.msk.bf16.gmra.mxu3 %vm435_vm0, %v2015_v12 }
  0xe7   :  { %1809 = vmatmul.msk.bf16.gmra.mxu0 %vm435_vm0, %v2016_v13  ;;  %1817 = vmatmul.msk.bf16.gmra.mxu1 %vm435_vm0, %v2016_v13 }
  0xe8   :  { %1824 = vmatmul.msk.bf16.gmra.mxu2 %vm435_vm0, %v2015_v12  ;;  %1833 = vmatmul.msk.bf16.gmra.mxu3 %vm435_vm0, %v2016_v13 }
  0xf7   :  { %1810 = vmatmul.msk.bf16.gmra.mxu0 %vm435_vm0, %v2017_v47  ;;  %1818 = vmatmul.msk.bf16.gmra.mxu1 %vm435_vm0, %v2017_v47 }
  0xf8   :  { %1825 = vmatmul.msk.bf16.gmra.mxu2 %vm435_vm0, %v2016_v13  ;;  %1834 = vmatmul.msk.bf16.gmra.mxu3 %vm435_vm0, %v2017_v47 }
 0x107   :  { %1811 = vmatmul.msk.bf16.gmra.mxu0 %vm435_vm0, %v2018_v14  ;;  %1819 = vmatmul.msk.bf16.gmra.mxu1 %vm435_vm0, %v2018_v14 }
 0x108   :  { %1826 = vmatmul.msk.bf16.gmra.mxu2 %vm435_vm0, %v2017_v47  ;;  %1835 = vmatmul.msk.bf16.gmra.mxu3 %vm435_vm0, %v2018_v14  ;;  %v2602_v47 = vpop.permute.xlu2 %362 }
 0x117   :  { %1812 = vmatmul.msk.bf16.gmra.mxu0 %vm435_vm0, %v2019_v15 }
 0x118   :  { %1827 = vmatmul.msk.bf16.gmra.mxu2 %vm435_vm0, %v2018_v14  ;;  %1836 = vmatmul.msk.bf16.gmra.mxu3 %vm435_vm0, %v2019_v15  ;;  %v2604_v14 = vpop.permute.xlu1 %352 }
 0x124   :  { %v2505_v17 = vpop.f32.mrf.mxu0  ;;  %v2507_v18 = vpop.f32.mrf.mxu1 }
 0x128   :  { %1828 = vmatmul.msk.bf16.gmra.mxu2 %vm435_vm0, %v2019_v15 }
 0x12b   :  { %v553_v19 = vpop.f32.mrf.mxu2  ;;  %v2510_v20 = vpop.f32.mrf.mxu3 }
 0x12c   :  { %3211 = vst [vmem:[#allocation5_spill] sm:$0xff] %v2510_v20  ;;  %v2512_v21 = vpop.f32.mrf.mxu0  ;;  %v2514_v22 = vpop.f32.mrf.mxu1  ;;  %v554_v24 = vadd.f32 %v553_v19, %v2516_v23 }
 0x12e   :  { %v713_v30 = vmax.f32 %v554_v24, 0.0 }
 0x133   :  { %v555_v25 = vpop.f32.mrf.mxu2  ;;  %v2521_v26 = vpop.f32.mrf.mxu3 }
 0x134   :  { %3212 = vst [vmem:[#allocation6_spill] sm:$0xff] %v2521_v26  ;;  %v556_v27 = vadd.f32 %v555_v25, %v2518_v35  ;;  %v2524_v28 = vpop.f32.mrf.mxu0  ;;  %v2526_v29 = vpop.f32.mrf.mxu1 }
 0x136   :  { %v717_v31 = vmax.f32 %v556_v27, 0.0 }
 0x138   :  { %v749_v32 = vpack.c.bf16 %v717_v31, %v713_v30 }
 0x13a   :  { %839 = vmatpush.bf16.msrb.mxu1 %v749_v32 }
 0x13b   :  { %v2528_v46 = vpop.f32.mrf.mxu2  ;;  %v2530_v36 = vpop.f32.mrf.mxu3 }
 0x13c   :  { %3213 = vst [vmem:[#allocation7_spill] sm:$0xff] %v2528_v46  ;;  %v2532_v37 = vpop.f32.mrf.mxu0  ;;  %v2534_v38 = vpop.f32.mrf.mxu1 }
 0x13d   :  { %3214 = vst [vmem:[#allocation8_spill] sm:$0xff] %v2530_v36  ;;  %v2613_v46 = vpop.permute.xlu0 %347 }
 0x143   :  { %v2536_v39 = vpop.f32.mrf.mxu2  ;;  %v2538_v40 = vpop.f32.mrf.mxu3 }
 0x144   :  { %3215 = vst [vmem:[#allocation9_spill] sm:$0xff] %v2536_v39  ;;  %v2540_v42 = vpop.f32.mrf.mxu0  ;;  %v2542_v41 = vpop.f32.mrf.mxu1 }
 0x14b   :  { %v2544_v43 = vpop.f32.mrf.mxu2  ;;  %v2546_v44 = vpop.f32.mrf.mxu3 }
 0x14c   :  { %3216 = vst [vmem:[#allocation10_spill] sm:$0xff] %v2544_v43  ;;  %v2548_v49 = vpop.f32.mrf.mxu0  ;;  %v2550_v50 = vpop.f32.mrf.mxu1 }
 0x153   :  { %v2552_v51 = vpop.f32.mrf.mxu2  ;;  %v2554_v33 = vpop.f32.mrf.mxu3 }
 0x154   :  { %3217 = vst [vmem:[#allocation11_spill] sm:$0xff] %v2552_v51  ;;  %v2556_v52 = vpop.f32.mrf.mxu0  ;;  %v533_v53 = vpop.f32.mrf.mxu1 }
 0x155   :  { %v534_v26 = vadd.f32 %v533_v53, %v2613_v46 }
 0x15b   :  { %v2558_v34 = vpop.f32.mrf.mxu2  ;;  %v2560_v54 = vpop.f32.mrf.mxu3 }
 0x15c   :  { %3218 = vst [vmem:[#allocation12_spill] sm:$0xff] %v2558_v34  ;;  %v2562_v56 = vpop.f32.mrf.mxu0  ;;  %v535_v57 = vpop.f32.mrf.mxu1 }
 0x15d   :  { %v2616_v34 = vpop.permute.xlu2 %337 }
 0x163   :  { %v2564_v58 = vpop.f32.mrf.mxu2  ;;  %v2566_v11 = vpop.f32.mrf.mxu3 }
 0x164   :  { %3219 = vst [vmem:[#allocation13_spill] sm:$0xff] %v2564_v58  ;;  %v2568_v16 = vpop.f32.mrf.mxu0  ;;  %v538_v48 = vpop.f32.mrf.mxu1 }
 0x16b   :  { %v2570_v59 = vpop.f32.mrf.mxu2  ;;  %v2572_v15 = vpop.f32.mrf.mxu3 }
 0x16c   :  { %3220 = vst [vmem:[#allocation14_spill] sm:$0xff] %v2570_v59  ;;  %v2574_v60 = vpop.f32.mrf.mxu0  ;;  %v540_v61 = vpop.f32.mrf.mxu1 }
 0x173   :  { %v2576_v62 = vpop.f32.mrf.mxu2  ;;  %v2578_v63 = vpop.f32.mrf.mxu3 }
 0x174   :  { %3221 = vst [vmem:[#allocation15_spill] sm:$0xff] %v2576_v62  ;;  %v2580_v0 = vpop.f32.mrf.mxu0  ;;  %v543_v1 = vpop.f32.mrf.mxu1  ;;  %v539_v62 = vadd.f32 %v538_v48, %v2594_v8 }
 0x175   :  { %v544_v39 = vadd.f32 %v543_v1, %v2586_v4  ;;  %v536_v1 = vadd.f32 %v535_v57, %v2604_v14  ;;  %v2630_v48 = vpop.permute.xlu2 %332 }
 0x17b   :  { %v2588_v55 = vpop.f32.mrf.mxu2  ;;  %v2590_v5 = vpop.f32.mrf.mxu3 }
 0x17c   :  { %3222 = vst [vmem:[#allocation16_spill] sm:$0xff] %v2588_v55  ;;  %v2592_v6 = vpop.f32.mrf.mxu0  ;;  %v545_v7 = vpop.f32.mrf.mxu1  ;;  %v697_v55 = vmax.f32 %v544_v39, 0.0 }
 0x17d   :  { %v546_v31 = vadd.f32 %v545_v7, %v2596_v9 }
 0x17f   :  { %v701_v58 = vmax.f32 %v546_v31, 0.0  ;;  %v681_v31 = vmax.f32 %v534_v26, 0.0 }
 0x183   :  { %v2598_v45 = vpop.f32.mrf.mxu2  ;;  %v2600_v10 = vpop.f32.mrf.mxu3 }
 0x184   :  { %3223 = vst [vmem:[#allocation17_spill] sm:$0xff] %v2598_v45  ;;  %v499_v12 = vpop.f32.mrf.mxu0  ;;  %v548_v13 = vpop.f32.mrf.mxu1 }
 0x185   :  { %v549_v19 = vadd.f32 %v548_v13, %v2584_v3  ;;  %v541_v13 = vadd.f32 %v540_v61, %v2602_v47  ;;  %v2622_v45 = vpop.permute.xlu1 %327  ;;  %v2626_v61 = vpop.permute.xlu0 %342 }
 0x186   :  { %v531_v39 = vadd.f32 %v2550_v50, %v2626_v61 }
 0x187   :  { %v705_v43 = vmax.f32 %v549_v19, 0.0  ;;  %v693_v19 = vmax.f32 %v541_v13, 0.0 }
 0x188   :  { %v677_v13 = vmax.f32 %v531_v39, 0.0 }
 0x18b   :  { %v2607_v24 = vpop.f32.mrf.mxu2  ;;  %v2609_v25 = vpop.f32.mrf.mxu3 }
 0x18c   :  { %3224 = vst [vmem:[#allocation18_spill] sm:$0xff] %v2607_v24  ;;  %v501_v27 = vpop.f32.mrf.mxu0  ;;  %v550_v30 = vpop.f32.mrf.mxu1  ;;  %v689_v24 = vmax.f32 %v539_v62, 0.0  ;;  %v526_v62 = vadd.f32 %v2534_v38, %v2630_v48 }
 0x18d   :  { %v551_v32 = vadd.f32 %v550_v30, %v2582_v2  ;;  %v502_v50 = vadd.f32 %v501_v27, %v2582_v2  ;;  %v2643_v26 = vpop.permute.xlu1 %322  ;;  %v497_v27 = vadd.f32 %v2592_v6, %v2596_v9  ;;  %v2650_v36 = vpop.permute.xlu0 %317 }
 0x18e   :  { %v521_v38 = vadd.f32 %v2514_v22, %v2643_v26  ;;  %v669_v39 = vmax.f32 %v526_v62, 0.0 }
 0x18f   :  { %v709_v51 = vmax.f32 %v551_v32, 0.0  ;;  %v741_v32 = vpack.c.bf16 %v701_v58, %v697_v55 }
 0x190   :  { %v661_v6 = vmax.f32 %v521_v38, 0.0 }
 0x191   :  { %v745_v59 = vpack.c.bf16 %v709_v51, %v705_v43  ;;  %v685_v43 = vmax.f32 %v536_v1, 0.0  ;;  %v737_v51 = vpack.c.bf16 %v693_v19, %v689_v24  ;;  %v500_v19 = vadd.f32 %v499_v12, %v2584_v3 }
 0x192   :  { %v519_v12 = vadd.f32 %v2507_v18, %v2650_v36 }
 0x193   :  { %v2620_v20 = vpop.f32.mrf.mxu2  ;;  %v648_v7 = vpop.f32.mrf.mxu3  ;;  %840 = vmatpush.bf16.msrb.mxu1 %v745_v59  ;;  %v529_v59 = vadd.f32 %v2542_v41, %v2616_v34  ;;  %v733_v1 = vpack.c.bf16 %v685_v43, %v681_v31  ;;  %v524_v41 = vadd.f32 %v2526_v29, %v2622_v45 }
 0x194   :  { %v504_v30 = vpop.f32.mrf.mxu0 }
 0x195   :  { %v505_v57 = vadd.f32 %v504_v30, %v2516_v23  ;;  %v673_v30 = vmax.f32 %v529_v59, 0.0  ;;  %v665_v59 = vmax.f32 %v524_v41, 0.0 }
 0x197   :  { %841 = vmatpush.bf16.msrb.mxu1 %v741_v32  ;;  %v712_v32 = vmax.f32 %v505_v57, 0.0  ;;  %v729_v31 = vpack.c.bf16 %v677_v13, %v673_v30  ;;  %v495_v57 = vadd.f32 %v2580_v0, %v2586_v4  ;;  %v649_v13 = vadd.f32 %v648_v7, %v2582_v2 }
 0x198   :  { %v725_v41 = vpack.c.bf16 %v669_v39, %v665_v59  ;;  %v647_v0 = vadd.f32 %v2609_v25, %v2584_v3  ;;  %v644_v7 = vadd.f32 %v2600_v10, %v2596_v9  ;;  %v487_v39 = vadd.f32 %v2562_v56, %v2604_v14 }
 0x199   :  { %v696_v38 = vmax.f32 %v495_v57, 0.0  ;;  %v485_v10 = vadd.f32 %v2556_v52, %v2613_v46  ;;  %v639_v56 = vadd.f32 %v2578_v63, %v2602_v47  ;;  %v480_v52 = vadd.f32 %v2540_v42, %v2616_v34 }
 0x19a   :  { %v703_v57 = vmax.f32 %v644_v7, 0.0  ;;  %v634_v63 = vadd.f32 %v2566_v11, %v2604_v14  ;;  %v475_v42 = vadd.f32 %v2524_v28, %v2622_v45  ;;  %v629_v11 = vadd.f32 %v2554_v33, %v2626_v61 }
 0x19b   :  { %v2635_v58 = vpop.f32.mrf.mxu2  ;;  %v651_v53 = vpop.f32.mrf.mxu3  ;;  %842 = vmatpush.bf16.msrb.mxu1 %v737_v51  ;;  %v627_v28 = vadd.f32 %v2546_v44, %v2616_v34  ;;  %v595_v44 = vadd.f32 %v2620_v20, %v2596_v9  ;;  %v2021_v9 = vld [vmem:[%s3203_s5 + $0x8] sm:$0xff] }
 0x19c   :  { %v506_v55 = vpop.f32.mrf.mxu0  ;;  %v652_v29 = vadd.f32 %v651_v53, %v2516_v23  ;;  %v492_v53 = vadd.f32 %v2574_v60, %v2602_v47  ;;  %v598_v33 = vadd.f32 %v2635_v58, %v2584_v3  ;;  %v3225_v58 = vld [vmem:[#allocation8_spill] sm:$0xff] }
 0x19d   :  { %v507_v24 = vadd.f32 %v506_v55, %v2518_v35  ;;  %v708_v55 = vmax.f32 %v502_v50, 0.0 }
 0x19e   :  { %v715_v30 = vmax.f32 %v652_v29, 0.0  ;;  %v707_v29 = vmax.f32 %v647_v0, 0.0 }
 0x19f   :  { %v716_v51 = vmax.f32 %v507_v24, 0.0  ;;  %843 = vmatpush.bf16.msrb.mxu1 %v733_v1  ;;  %v704_v24 = vmax.f32 %v500_v19, 0.0  ;;  %v700_v1 = vmax.f32 %v497_v27, 0.0  ;;  %v692_v27 = vmax.f32 %v492_v53, 0.0 }
 0x1a0   :  { %v680_v53 = vmax.f32 %v485_v10, 0.0 }
 0x1a1   :  { %v748_v43 = vpack.c.bf16 %v716_v51, %v712_v32  ;;  %v744_v18 = vpack.c.bf16 %v708_v55, %v704_v24  ;;  %v657_v32 = vmax.f32 %v519_v12, 0.0  ;;  %v490_v51 = vadd.f32 %v2568_v16, %v2594_v8  ;;  %v2676_v16 = vld [vmem:[%s3203_s5] sm:$0xff] }
 0x1a2   :  { %v740_v55 = vpack.c.bf16 %v700_v1, %v696_v38  ;;  %v695_v1 = vmax.f32 %v639_v56, 0.0  ;;  %v687_v38 = vmax.f32 %v634_v63, 0.0 }
 0x1a3   :  { %v2657_v22 = vpop.f32.mrf.mxu2  ;;  %v653_v62 = vpop.f32.mrf.mxu3  ;;  %800 = vmatpush.bf16.msrb.mxu0 %v748_v43  ;;  %844 = vmatpush.bf16.msrb.mxu1 %v729_v31  ;;  %v711_v43 = vmax.f32 %v649_v13, 0.0  ;;  %v721_v25 = vpack.c.bf16 %v661_v6, %v657_v32  ;;  %v642_v31 = vadd.f32 %v2590_v5, %v2586_v4  ;;  %v688_v12 = vmax.f32 %v490_v51, 0.0 }
 0x1a4   :  { %v654_v50 = vadd.f32 %v653_v62, %v2518_v35  ;;  %v482_v5 = vadd.f32 %v2548_v49, %v2626_v61  ;;  %v684_v62 = vmax.f32 %v487_v39, 0.0  ;;  %v637_v13 = vadd.f32 %v2572_v15, %v2594_v8 }
 0x1a5   :  { %v747_v24 = vpack.c.bf16 %v711_v43, %v707_v29  ;;  %v736_v6 = vpack.c.bf16 %v692_v27, %v688_v12  ;;  %v477_v49 = vadd.f32 %v2532_v37, %v2630_v48  ;;  %v632_v15 = vadd.f32 %v2560_v54, %v2613_v46 }
 0x1a6   :  { %v719_v19 = vmax.f32 %v654_v50, 0.0  ;;  %v699_v50 = vmax.f32 %v642_v31, 0.0  ;;  %v732_v0 = vpack.c.bf16 %v684_v62, %v680_v53  ;;  %v672_v32 = vmax.f32 %v480_v52, 0.0  ;;  %v3228_v62 = vld [vmem:[#allocation17_spill] sm:$0xff] }
 0x1a7   :  { %801 = vmatpush.bf16.msrb.mxu0 %v744_v18  ;;  %845 = vmatpush.bf16.msrb.mxu1 %v725_v41  ;;  %v676_v41 = vmax.f32 %v482_v5, 0.0  ;;  %v600_v37 = vadd.f32 %v2657_v22, %v2582_v2  ;;  %v668_v43 = vmax.f32 %v477_v49, 0.0  ;;  %v683_v39 = vmax.f32 %v632_v15, 0.0  ;;  %v3229_v53 = vld [vmem:[#allocation5_spill] sm:$0xff]  ;;  %v3231_v15 = vld [vmem:[#allocation15_spill] sm:$0xff] }
 0x1a8   :  { %v751_v60 = vpack.c.bf16 %v719_v19, %v715_v30  ;;  %v743_v18 = vpack.c.bf16 %v703_v57, %v699_v50  ;;  %v691_v30 = vmax.f32 %v637_v13, 0.0  ;;  %v470_v2 = vadd.f32 %v2505_v17, %v2650_v36  ;;  %v3226_v17 = vld [vmem:[#allocation18_spill] sm:$0xff] }
 0x1a9   :  { %v624_v22 = vadd.f32 %v2538_v40, %v2630_v48  ;;  %v735_v29 = vpack.c.bf16 %v687_v38, %v683_v39  ;;  %v622_v12 = vadd.f32 %v3225_v58, %v2622_v45  ;;  %v593_v56 = vadd.f32 %v3226_v17, %v2586_v4 }
 0x1aa   :  { %917 = vmatpush.bf16.msrb.mxu3 %v751_v60  ;;  %v739_v54 = vpack.c.bf16 %v695_v1, %v691_v30  ;;  %v728_v60 = vpack.c.bf16 %v676_v41, %v672_v32  ;;  %v706_v57 = vmax.f32 %v598_v33, 0.0  ;;  %v656_v40 = vmax.f32 %v470_v2, 0.0  ;;  %v2022_v2 = vld [vmem:[%s3203_s5 + $0x10] sm:$0xff] }
 0x1ab   :  { %v602_v59 = vpop.f32.mrf.mxu2  ;;  %802 = vmatpush.bf16.msrb.mxu0 %v740_v55  ;;  %846 = vmatpush.bf16.msrb.mxu1 %v721_v25  ;;  %v710_v25 = vmax.f32 %v600_v37, 0.0  ;;  %v671_v20 = vmax.f32 %v624_v22, 0.0  ;;  %v702_v13 = vmax.f32 %v595_v44, 0.0  ;;  %v617_v63 = vadd.f32 %v3229_v53, %v2650_v36 }
 0x1ac   :  { %v603_v19 = vadd.f32 %v602_v59, %v2516_v23  ;;  %v472_v23 = vadd.f32 %v2512_v21, %v2643_v26  ;;  %v679_v21 = vmax.f32 %v629_v11, 0.0  ;;  %v675_v59 = vmax.f32 %v627_v28, 0.0  ;;  %v3232_v11 = vld [vmem:[#allocation14_spill] sm:$0xff] }
 0x1ad   :  { %v746_v50 = vpack.c.bf16 %v710_v25, %v706_v57  ;;  %v667_v1 = vmax.f32 %v622_v12, 0.0  ;;  %v698_v41 = vmax.f32 %v593_v56, 0.0  ;;  %v659_v32 = vmax.f32 %v617_v63, 0.0 }
 0x1ae   :  { %918 = vmatpush.bf16.msrb.mxu3 %v747_v24  ;;  %847 = vmatmul.bf16.vlgmr.msrb.gmra.mxu1 %v2676_v16  ;;  %v714_v27 = vmax.f32 %v603_v19, 0.0  ;;  %v660_v10 = vmax.f32 %v472_v23, 0.0  ;;  %v3227_v24 = vld [vmem:[#allocation6_spill] sm:$0xff]  ;;  %v731_v52 = vpack.c.bf16 %v679_v21, %v675_v59 }
 0x1af   :  { %803 = vmatpush.bf16.msrb.mxu0 %v736_v6  ;;  %v619_v5 = vadd.f32 %v3227_v24, %v2643_v26  ;;  %v590_v6 = vadd.f32 %v3228_v62, %v2602_v47  ;;  %v585_v47 = vadd.f32 %v3231_v15, %v2604_v14  ;;  %v742_v19 = vpack.c.bf16 %v702_v13, %v698_v41  ;;  %v3234_v14 = vld [vmem:[#allocation12_spill] sm:$0xff] }
 0x1b0   :  { %v720_v4 = vpack.c.bf16 %v660_v10, %v656_v40 }
 0x1b1   :  { %v694_v30 = vmax.f32 %v590_v6, 0.0 }
 0x1b2   :  { %919 = vmatpush.bf16.msrb.mxu3 %v743_v18  ;;  %v3230_v18 = vld [vmem:[#allocation16_spill] sm:$0xff] }
 0x1b3   :  { %v604_v51 = vpop.f32.mrf.mxu2  ;;  %804 = vmatpush.bf16.msrb.mxu0 %v732_v0  ;;  %v588_v49 = vadd.f32 %v3230_v18, %v2594_v8  ;;  %v663_v0 = vmax.f32 %v619_v5, 0.0  ;;  %v3233_v8 = vld [vmem:[#allocation13_spill] sm:$0xff] }
 0x1b4   :  { %v605_v7 = vadd.f32 %v604_v51, %v2518_v35  ;;  %v664_v35 = vmax.f32 %v475_v42, 0.0  ;;  %v727_v42 = vpack.c.bf16 %v671_v20, %v667_v1  ;;  %v583_v51 = vadd.f32 %v3232_v11, %v2613_v46 }
 0x1b5   :  { %v690_v38 = vmax.f32 %v588_v49, 0.0  ;;  %v580_v37 = vadd.f32 %v3233_v8, %v2626_v61  ;;  %v723_v23 = vpack.c.bf16 %v663_v0, %v659_v32 }
 0x1b6   :  { %v718_v55 = vmax.f32 %v605_v7, 0.0  ;;  %920 = vmatpush.bf16.msrb.mxu3 %v739_v54  ;;  %v724_v3 = vpack.c.bf16 %v668_v43, %v664_v35  ;;  %v686_v7 = vmax.f32 %v585_v47, 0.0  ;;  %v578_v43 = vadd.f32 %v3234_v14, %v2616_v34  ;;  %v3237_v34 = vld [vmem:[#allocation9_spill] sm:$0xff] }
 0x1b7   :  { %805 = vmatpush.bf16.msrb.mxu0 %v728_v60  ;;  %v738_v54 = vpack.c.bf16 %v694_v30, %v690_v38  ;;  %v682_v28 = vmax.f32 %v583_v51, 0.0  ;;  %v3235_v60 = vld [vmem:[#allocation11_spill] sm:$0xff]  ;;  %v678_v39 = vmax.f32 %v580_v37, 0.0  ;;  %v570_v35 = vadd.f32 %v3237_v34, %v2643_v26 }
 0x1b8   :  { %v750_v31 = vpack.c.bf16 %v718_v55, %v714_v27  ;;  %v575_v46 = vadd.f32 %v3235_v60, %v2630_v48  ;;  %v3236_v27 = vld [vmem:[#allocation10_spill] sm:$0xff]  ;;  %v674_v61 = vmax.f32 %v578_v43, 0.0  ;;  %v3238_v48 = vld [vmem:[#allocation7_spill] sm:$0xff] }
 0x1b9   :  { %v734_v33 = vpack.c.bf16 %v686_v7, %v682_v28  ;;  %v573_v55 = vadd.f32 %v3236_v27, %v2622_v45  ;;  %v568_v44 = vadd.f32 %v3238_v48, %v2650_v36  ;;  %v2023_v26 = vld [vmem:[%s3203_s5 + $0x18] sm:$0xff]  ;;  %v2024_v36 = vld [vmem:[%s3203_s5 + $0x20] sm:$0xff] }
 0x1ba   :  { %878 = vmatpush.bf16.msra.mxu2 %v750_v31  ;;  %921 = vmatpush.bf16.msrb.mxu3 %v735_v29  ;;  %v670_v22 = vmax.f32 %v575_v46, 0.0  ;;  %v730_v21 = vpack.c.bf16 %v678_v39, %v674_v61  ;;  %v662_v31 = vmax.f32 %v570_v35, 0.0 }
 0x1bb   :  { %806 = vmatpush.bf16.msrb.mxu0 %v724_v3  ;;  %v666_v25 = vmax.f32 %v573_v55, 0.0  ;;  %v658_v45 = vmax.f32 %v568_v44, 0.0  ;;  %v989_v55 = vlaneseq }
 0x1bd   :  { %v726_v29 = vpack.c.bf16 %v670_v22, %v666_v25  ;;  %v722_v10 = vpack.c.bf16 %v662_v31, %v658_v45  ;;  %v2823_v61 = vand.u32 127, %v989_v55  ;;  %v2033_v45 = vld [vmem:[%s3206_s8 + $0x38] sm:$0xff] }
 0x1be   :  { %879 = vmatpush.bf16.msra.mxu2 %v746_v50  ;;  %922 = vmatpush.bf16.msrb.mxu3 %v731_v52 }
 0x1bf   :  { %852 = vmatmul.bf16.gmra.mxu1 %v2021_v9  ;;  %807 = vmatpush.bf16.msrb.mxu0 %v720_v4  ;;  %vm991_vm1 = vcmp.lt.s32.totalorder %v2823_v61, 1  ;;  %vm1082_vm2 = vcmp.lt.s32.totalorder %v2823_v61, 127 }
 0x1c2   :  { %880 = vmatpush.bf16.msra.mxu2 %v742_v19  ;;  %923 = vmatpush.bf16.msrb.mxu3 %v727_v42 }
 0x1c3   :  { %808 = vmatmul.bf16.vlgmr.msrb.gmra.mxu0 %v2676_v16 }
 0x1c4   :  { %1404 = vmatpush.bf16.msra.mxu0 %v2033_v45 }
 0x1c6   :  { %881 = vmatpush.bf16.msra.mxu2 %v738_v54  ;;  %924 = vmatpush.bf16.msrb.mxu3 %v723_v23 }
 0x1c9   :  { %925 = vmatmul.bf16.vlgmr.msrb.gmra.mxu3 %v2676_v16 }
 0x1ca   :  { %882 = vmatpush.bf16.msra.mxu2 %v734_v33 }
 0x1ce   :  { %883 = vmatpush.bf16.msra.mxu2 %v730_v21 }
 0x1cf   :  { %857 = vmatmul.bf16.gmra.mxu1 %v2022_v2 }
 0x1d2   :  { %884 = vmatpush.bf16.msra.mxu2 %v726_v29 }
 0x1d3   :  { %813 = vmatmul.bf16.gmra.mxu0 %v2021_v9 }
 0x1d6   :  { %885 = vmatpush.bf16.msra.mxu2 %v722_v10  ;;  %v2032_v10 = vld [vmem:[%s3206_s8 + $0x30] sm:$0xff] }
 0x1d7   :  { %1405 = vmatpush.bf16.msra.mxu0 %v2032_v10 }
 0x1d9   :  { %886 = vmatmul.bf16.vlgmr.msra.gmra.mxu2 %v2676_v16  ;;  %930 = vmatmul.bf16.gmra.mxu3 %v2021_v9  ;;  %v2025_v16 = vld [vmem:[%s3203_s5 + $0x28] sm:$0xff]  ;;  %s2117_s5 = smov 127  }
 0x1df   :  { %862 = vmatmul.bf16.gmra.mxu1 %v2023_v26 }
 0x1e3   :  { %818 = vmatmul.bf16.gmra.mxu0 %v2022_v2 }
 0x1e9   :  { %891 = vmatmul.bf16.gmra.mxu2 %v2021_v9  ;;  %935 = vmatmul.bf16.gmra.mxu3 %v2022_v2 }
 0x1ef   :  { %867 = vmatmul.bf16.gmra.mxu1 %v2024_v36 }
 0x1f3   :  { %823 = vmatmul.bf16.gmra.mxu0 %v2023_v26 }
 0x1f9   :  { %896 = vmatmul.bf16.gmra.mxu2 %v2022_v2  ;;  %940 = vmatmul.bf16.gmra.mxu3 %v2023_v26  ;;  %v2828_v2 = vld [vmem:[%s3204_s6] sm:$0xf]  ;;  %s2120_s6 = smov 32  }
 0x1fa   :  { %v2833_v22 = vperm.slane %v2828_v2, 2  ;;  %v2955_v45 = vperm.slane %v2828_v2, 0 }
 0x1ff   :  { %872 = vmatmul.bf16.gmra.mxu1 %v2025_v16 }
 0x203   :  { %828 = vmatmul.bf16.gmra.mxu0 %v2024_v36 }
 0x209   :  { %901 = vmatmul.bf16.gmra.mxu2 %v2023_v26  ;;  %945 = vmatmul.bf16.gmra.mxu3 %v2024_v36  ;;  %v2057_v26 = vld [vmem:[%s3206_s8 + $0xf8] sm:$0xff] }
 0x20a   :  { %1461 = vmatpush.bf16.msra.mxu3 %v2057_v26 }
 0x213   :  { %833 = vmatmul.bf16.gmra.mxu0 %v2025_v16 }
 0x219   :  { %906 = vmatmul.bf16.gmra.mxu2 %v2024_v36  ;;  %950 = vmatmul.bf16.gmra.mxu3 %v2025_v16  ;;  %v2031_v36 = vld [vmem:[%s3206_s8 + $0x28] sm:$0xff] }
 0x21a   :  { %1406 = vmatpush.bf16.msra.mxu0 %v2031_v36 }
 0x229   :  { %911 = vmatmul.bf16.gmra.mxu2 %v2025_v16  ;;  %v2056_v16 = vld [vmem:[%s3206_s8 + $0xf0] sm:$0xff] }
 0x22a   :  { %1462 = vmatpush.bf16.msra.mxu3 %v2056_v16 }
 0x22b   :  { %v848_v3 = vpop.f32.mrf.mxu1 }
 0x22c   :  { %965 = vrot.lane.b32.xlu2 %v848_v3, %s2116_s14 }
 0x233   :  { %v850_v58 = vpop.f32.mrf.mxu1 }
 0x234   :  { %967 = vrot.lane.b32.xlu0 %v850_v58, %s2116_s14  ;;  %v2030_v58 = vld [vmem:[%s3206_s8 + $0x20] sm:$0xff] }
 0x235   :  { %1407 = vmatpush.bf16.msra.mxu0 %v2030_v58 }
 0x23c   :  { %v853_v12 = vpop.f32.mrf.mxu1 }
 0x23d   :  { %969 = vrot.lane.b32.xlu0 %v853_v12, %s2116_s14  ;;  %v2055_v12 = vld [vmem:[%s3206_s8 + $0xe8] sm:$0xff] }
 0x23e   :  { %1463 = vmatpush.bf16.msra.mxu3 %v2055_v12  ;;  %v2035_v12 = vld [vmem:[%s3206_s8 + $0x48] sm:$0xff] }
 0x240   :  { %v809_v59 = vpop.f32.mrf.mxu0 }
 0x244   :  { %v855_v17 = vpop.f32.mrf.mxu1 }
 0x245   :  { %971 = vrot.lane.b32.xlu1 %v855_v17, %s2116_s14  ;;  %957 = vrot.lane.b32.xlu0 %v809_v59, %s2116_s14  ;;  %v2029_v59 = vld [vmem:[%s3206_s8 + $0x18] sm:$0xff]  ;;  %v2054_v17 = vld [vmem:[%s3206_s8 + $0xe0] sm:$0xff] }
 0x246   :  { %1408 = vmatpush.bf16.msra.mxu0 %v2029_v59  ;;  %1464 = vmatpush.bf16.msra.mxu3 %v2054_v17  ;;  %v2043_v59 = vld [vmem:[%s3206_s8 + $0x88] sm:$0xff] }
 0x248   :  { %v811_v56 = vpop.f32.mrf.mxu0 }
 0x24c   :  { %v2766_v57 = vpop.f32.mrf.mxu1  ;;  %v926_v40 = vpop.f32.mrf.mxu3 }
 0x24d   :  { %981 = vrot.lane.b32.xlu0 %v926_v40, %s2116_s14  ;;  %959 = vrot.lane.b32.xlu1 %v811_v56, %s2116_s14 }
 0x250   :  { %v814_v24 = vpop.f32.mrf.mxu0 }
 0x254   :  { %v2770_v5 = vpop.f32.mrf.mxu1  ;;  %v928_v20 = vpop.f32.mrf.mxu3 }
 0x255   :  { %983 = vrot.lane.b32.xlu1 %v928_v20, %s2116_s14  ;;  %v2028_v20 = vld [vmem:[%s3206_s8 + $0x10] sm:$0xff] }
 0x256   :  { %1409 = vmatpush.bf16.msra.mxu0 %v2028_v20 }
 0x258   :  { %v816_v9 = vpop.f32.mrf.mxu0 }
 0x25c   :  { %v2773_v62 = vpop.f32.mrf.mxu1  ;;  %v887_v6 = vpop.f32.mrf.mxu2 }
 0x25d   :  { %v931_v13 = vpop.f32.mrf.mxu3  ;;  %973 = vrot.lane.b32.xlu1 %v887_v6, %s2116_s14  ;;  %v2027_v6 = vld [vmem:[%s3206_s8 + $0x8] sm:$0xff] }
 0x25e   :  { %1410 = vmatpush.bf16.msra.mxu0 %v2027_v6 }
 0x260   :  { %v2776_v50 = vpop.f32.mrf.mxu0 }
 0x264   :  { %v2778_v52 = vpop.f32.mrf.mxu1  ;;  %v889_v4 = vpop.f32.mrf.mxu2 }
 0x265   :  { %v933_v53 = vpop.f32.mrf.mxu3  ;;  %975 = vrot.lane.b32.xlu2 %v889_v4, %s2116_s14  ;;  %985 = vrot.lane.b32.xlu1 %v931_v13, %s2116_s14  ;;  %v2052_v13 = vld [vmem:[%s3206_s8 + $0xd0] sm:$0xff] }
 0x268   :  { %v2782_v63 = vpop.f32.mrf.mxu0 }
 0x26c   :  { %v868_v1 = vpop.f32.mrf.mxu1  ;;  %v892_v18 = vpop.f32.mrf.mxu2 }
 0x26d   :  { %v2784_v49 = vpop.f32.mrf.mxu3  ;;  %987 = vrot.lane.b32.xlu2 %v933_v53, %s2116_s14  ;;  %1058 = vrot.lane.b32.xlu1 %v868_v1, %s2117_s5  ;;  %v2026_v53 = vld [vmem:[%s3206_s8] sm:$0xff]  ;;  %v2041_v1 = vld [vmem:[%s3206_s8 + $0x78] sm:$0xff] }
 0x26e   :  { %1411 = vmatpush.bf16.msra.mxu0 %v2026_v53  ;;  %1423 = vmatpush.bf16.msra.mxu1 %v2041_v1 }
 0x270   :  { %v2788_v41 = vpop.f32.mrf.mxu0 }
 0x274   :  { %v894_v0 = vpop.f32.mrf.mxu2  ;;  %v870_v30 = vpop.f32.mrf.mxu1 }
 0x275   :  { %v2790_v15 = vpop.f32.mrf.mxu3  ;;  %977 = vrot.lane.b32.xlu2 %v892_v18, %s2116_s14  ;;  %979 = vrot.lane.b32.xlu0 %v894_v0, %s2116_s14  ;;  %v2049_v18 = vld [vmem:[%s3206_s8 + $0xb8] sm:$0xff] }
 0x276   :  { %1442 = vmatpush.bf16.msrb.mxu2 %v2049_v18 }
 0x278   :  { %v2794_v47 = vpop.f32.mrf.mxu0 }
 0x27c   :  { %v2796_v19 = vpop.f32.mrf.mxu2  ;;  %v873_v39 = vpop.f32.mrf.mxu1 }
 0x27d   :  { %v2798_v42 = vpop.f32.mrf.mxu3  ;;  %1060 = vrot.lane.b32.xlu2 %v870_v30, %s2117_s5 }
 0x280   :  { %v829_v32 = vpop.f32.mrf.mxu0 }
 0x284   :  { %v899_v11 = vpop.f32.mrf.mxu2  ;;  %v875_v35 = vpop.f32.mrf.mxu1 }
 0x285   :  { %v2801_v51 = vpop.f32.mrf.mxu3  ;;  %1050 = vrot.lane.b32.xlu2 %v829_v32, %s2117_s5  ;;  %v2051_v32 = vld [vmem:[%s3206_s8 + $0xc8] sm:$0xff] }
 0x286   :  { %v2820_v27 = vpop.permute.xlu2 %965 }
 0x288   :  { %v831_v38 = vpop.f32.mrf.mxu0 }
 0x289   :  { %1052 = vrot.lane.b32.xlu0 %v831_v38, %s2117_s5  ;;  %v2048_v38 = vld [vmem:[%s3206_s8 + $0xb0] sm:$0xff] }
 0x28a   :  { %1443 = vmatpush.bf16.msrb.mxu2 %v2048_v38  ;;  %v2034_v38 = vld [vmem:[%s3206_s8 + $0x40] sm:$0xff] }
 0x28c   :  { %v2805_v8 = vpop.f32.mrf.mxu2 }
 0x28d   :  { %v946_v37 = vpop.f32.mrf.mxu3 }
 0x28e   :  { %1074 = vrot.lane.b32.xlu1 %v946_v37, %s2117_s5  ;;  %v2050_v37 = vld [vmem:[%s3206_s8 + $0xc0] sm:$0xff] }
 0x290   :  { %v834_v7 = vpop.f32.mrf.mxu0 }
 0x291   :  { %1054 = vrot.lane.b32.xlu0 %v834_v7, %s2117_s5  ;;  %v2039_v7 = vld [vmem:[%s3206_s8 + $0x68] sm:$0xff] }
 0x294   :  { %v2809_v54 = vpop.f32.mrf.mxu2 }
 0x295   :  { %v948_v23 = vpop.f32.mrf.mxu3 }
 0x296   :  { %961 = vrot.lane.b32.xlu1 %v814_v24, %s2116_s14  ;;  %1076 = vrot.lane.b32.xlu2 %v948_v23, %s2117_s5  ;;  %v2047_v23 = vld [vmem:[%s3206_s8 + $0xa8] sm:$0xff] }
 0x297   :  { %1444 = vmatpush.bf16.msrb.mxu2 %v2047_v23 }
 0x298   :  { %v836_v34 = vpop.f32.mrf.mxu0 }
 0x29c   :  { %v907_v14 = vpop.f32.mrf.mxu2 }
 0x29d   :  { %v951_v43 = vpop.f32.mrf.mxu3 }
 0x29e   :  { %1066 = vrot.lane.b32.xlu2 %v907_v14, %s2117_s5 }
 0x2a4   :  { %v909_v28 = vpop.f32.mrf.mxu2 }
 0x2a5   :  { %1068 = vrot.lane.b32.xlu0 %v909_v28, %s2117_s5  ;;  %v953_v46 = vpop.f32.mrf.mxu3 }
 0x2a6   :  { %963 = vrot.lane.b32.xlu2 %v816_v9, %s2116_s14  ;;  %v2835_v21 = vpop.permute.xlu0 %967  ;;  %v2053_v9 = vld [vmem:[%s3206_s8 + $0xd8] sm:$0xff] }
 0x2a7   :  { %1465 = vmatpush.bf16.msra.mxu3 %v2053_v9  ;;  %v2977_v9 = vperm.slane %v2828_v2, 3 }
 0x2ab   :  { %1466 = vmatpush.bf16.msra.mxu3 %v2052_v13 }
 0x2ac   :  { %v912_v60 = vpop.f32.mrf.mxu2 }
 0x2ad   :  { %1080 = vrot.lane.b32.xlu0 %v953_v46, %s2117_s5  ;;  %v2046_v46 = vld [vmem:[%s3206_s8 + $0xa0] sm:$0xff] }
 0x2ae   :  { %1078 = vrot.lane.b32.xlu2 %v951_v43, %s2117_s5  ;;  %1445 = vmatpush.bf16.msrb.mxu2 %v2046_v46 }
 0x2af   :  { %v2880_v40 = vpop.permute.xlu0 %969  ;;  %1467 = vmatpush.bf16.msra.mxu3 %v2051_v32 }
 0x2b3   :  { %1468 = vmatpush.bf16.msra.mxu3 %v2050_v37 }
 0x2b4   :  { %v914_v33 = vpop.f32.mrf.mxu2 }
 0x2b5   :  { %1072 = vrot.lane.b32.xlu1 %v914_v33, %s2117_s5  ;;  %1070 = vrot.lane.b32.xlu0 %v912_v60, %s2117_s5  ;;  %v2038_v60 = vld [vmem:[%s3206_s8 + $0x60] sm:$0xff]  ;;  %v2045_v33 = vld [vmem:[%s3206_s8 + $0x98] sm:$0xff] }
 0x2b6   :  { %1062 = vrot.lane.b32.xlu2 %v873_v39, %s2117_s5  ;;  %v2037_v39 = vld [vmem:[%s3206_s8 + $0x58] sm:$0xff]  ;;  %1446 = vmatpush.bf16.msrb.mxu2 %v2045_v33 }
 0x2b7   :  { %v2845_v31 = vpop.permute.xlu1 %971  ;;  %v2905_v0 = vpop.permute.xlu0 %957 }
 0x2bd   :  { %1064 = vrot.lane.b32.xlu0 %v875_v35, %s2117_s5  ;;  %1056 = vrot.lane.b32.xlu1 %v836_v34, %s2117_s5  ;;  %v1049_v34 = vld [vmem:[%s3205_s7] sm:$0xf] }
 0x2be   :  { %v2964_v16 = vperm.slane %v1049_v34, 0  ;;  %v2986_v32 = vperm.slane %v1049_v34, 3 }
 0x2bf   :  { %v2838_v48 = vpop.permute.xlu2 %975  ;;  %v2864_v3 = vpop.permute.xlu1 %959 }
 0x2c0   :  { %v997_v44 = vsel %vm991_vm1, %v2835_v21, %v2838_v48  ;;  %v982_v43 = vpop.permute.xlu0 %981 }
 0x2c1   :  { %v1023_v25 = vmul.f32 %v2833_v22, %v997_v44  ;;  %v2036_v44 = vld [vmem:[%s3206_s8 + $0x50] sm:$0xff]  ;;  %v1004_v26 = vsel %vm991_vm1, %v982_v43, %v2905_v0 }
 0x2c2   :  { %v1017_v17 = vmul.f32 %v2955_v45, %v1004_v26 }
 0x2c3   :  { %v2847_v29 = vadd.f32 %v1023_v25, %v899_v11  ;;  %v2040_v11 = vld [vmem:[%s3206_s8 + $0x70] sm:$0xff] }
 0x2c4   :  { %1424 = vmatpush.bf16.msra.mxu1 %v2040_v11  ;;  %v2044_v25 = vld [vmem:[%s3206_s8 + $0x90] sm:$0xff] }
 0x2c5   :  { %1447 = vmatpush.bf16.msrb.mxu2 %v2044_v25 }
 0x2c7   :  { %v2878_v56 = vpop.permute.xlu2 %987  ;;  %v984_v24 = vpop.permute.xlu1 %983 }
 0x2c8   :  { %1425 = vmatpush.bf16.msra.mxu1 %v2039_v7  ;;  %v1005_v36 = vsel %vm991_vm1, %v984_v24, %v2864_v3  ;;  %v993_v6 = vsel %vm991_vm1, %v2838_v48, %v984_v24  ;;  %v2042_v48 = vld [vmem:[%s3206_s8 + $0x80] sm:$0xff]  ;;  %v1033_v24 = vadd.f32 %v1017_v17, %v2776_v50 }
 0x2c9   :  { %v1021_v20 = vmul.f32 %v2955_v45, %v1005_v36  ;;  %1448 = vmatpush.bf16.msrb.mxu2 %v2043_v59 }
 0x2cb   :  { %v1037_v37 = vadd.f32 %v1021_v20, %v2782_v63 }
 0x2cc   :  { %1426 = vmatpush.bf16.msra.mxu1 %v2038_v60 }
 0x2cd   :  { %1449 = vmatpush.bf16.msrb.mxu2 %v2042_v48 }
 0x2cf   :  { %v2894_v4 = vpop.permute.xlu2 %977  ;;  %v2907_v30 = vpop.permute.xlu1 %973 }
 0x2d0   :  { %1427 = vmatpush.bf16.msra.mxu1 %v2037_v39  ;;  %v992_v13 = vsel %vm991_vm1, %v2907_v30, %v982_v43  ;;  %v1024_v43 = vmul.f32 %v2977_v9, %v993_v6  ;;  %v3023_v6 = vperm.slane %v2828_v2, 1 }
 0x2d1   :  { %v1020_v60 = vmul.f32 %v2977_v9, %v992_v13  ;;  %v3037_v13 = vperm.slane %v1049_v34, 1 }
 0x2d2   :  { %v1040_v25 = vadd.f32 %v1024_v43, %v2790_v15  ;;  %v1001_v15 = vsel %vm991_vm1, %v2864_v3, %v2835_v21 }
 0x2d3   :  { %v1036_v26 = vadd.f32 %v1020_v60, %v2784_v49  ;;  %v1000_v49 = vsel %vm991_vm1, %v2905_v0, %v2820_v27 }
 0x2d4   :  { %1428 = vmatpush.bf16.msra.mxu1 %v2036_v44  ;;  %v1018_v2 = vmul.f32 %v3023_v6, %v1000_v49 }
 0x2d7   :  { %v2927_v14 = vpop.permute.xlu2 %1060  ;;  %v2929_v28 = vpop.permute.xlu1 %985 }
 0x2d8   :  { %1429 = vmatpush.bf16.msra.mxu1 %v2035_v12 }
 0x2dc   :  { %1430 = vmatpush.bf16.msra.mxu1 %v2034_v38  ;;  %v1022_v38 = vmul.f32 %v3023_v6, %v1001_v15 }
 0x2df   :  { %v1051_v35 = vpop.permute.xlu2 %1050  ;;  %v1059_v10 = vpop.permute.xlu1 %1058 }
 0x2e0   :  { %v1091_v58 = vsel %vm1082_vm2, %v1051_v35, %v1059_v10 }
 0x2e1   :  { %v1108_v53 = vmul.f32 %v2964_v16, %v1091_v58 }
 0x2e3   :  { %v3004_v46 = vadd.f32 %v1108_v53, %v1033_v24  ;;  %v1102_v53 = vperm.slane %v1049_v34, 2  ;;  %v1038_v24 = vadd.f32 %v1022_v38, %v2770_v5 }
 0x2e7   :  { %v2943_v55 = vpop.permute.xlu0 %979 }
 0x2f0   :  { %v1077_v18 = vpop.permute.xlu2 %1076 }
 0x2f8   :  { %v1067_v17 = vpop.permute.xlu2 %1066 }
 0x2fb   :  { %v1053_v1 = vpop.permute.xlu0 %1052 }
 0x2fc   :  { %v1092_v11 = vsel %vm1082_vm2, %v1053_v1, %v2927_v14  ;;  %v1096_v7 = vsel %vm1082_vm2, %v1077_v18, %v1053_v1  ;;  %v1087_v1 = vsel %vm1082_vm2, %v1059_v10, %v1067_v17 }
 0x2fd   :  { %v1112_v23 = vmul.f32 %v2964_v16, %v1092_v11  ;;  %v1115_v33 = vmul.f32 %v2986_v32, %v1096_v7  ;;  %v1109_v3 = vmul.f32 %v3037_v13, %v1087_v1 }
 0x2ff   :  { %v3006_v39 = vadd.f32 %v1112_v23, %v1037_v37  ;;  %v3016_v58 = vadd.f32 %v1115_v33, %v1040_v25  ;;  %v994_v25 = vsel %vm991_vm1, %v2894_v4, %v2929_v28 }
 0x300   :  { %v1075_v50 = vpop.permute.xlu1 %1074  ;;  %v964_v11 = vpop.permute.xlu2 %963 }
 0x301   :  { %v1140_v63 = vpack.c.bf16 %v3006_v39, %v3004_v46  ;;  %v1095_v44 = vsel %vm1082_vm2, %v1075_v50, %v1051_v35  ;;  %v996_v35 = vsel %vm991_vm1, %v2820_v27, %v2907_v30  ;;  %v1083_v0 = vsel %vm1082_vm2, %v1067_v17, %v1075_v50 }
 0x302   :  { %v1111_v36 = vmul.f32 %v2986_v32, %v1095_v44  ;;  %v1019_v21 = vmul.f32 %v2833_v22, %v996_v35  ;;  %v1110_v48 = vmul.f32 %v1102_v53, %v1083_v0  ;;  %v1034_v30 = vadd.f32 %v1018_v2, %v2766_v57 }
 0x303   :  { %1412 = vmatmul.bf16.vlgmr.msra.gmra.mxu0 %v1140_v63  ;;  %v1055_v20 = vpop.permute.xlu0 %1054  ;;  %v998_v63 = vsel %vm991_vm1, %v2880_v40, %v2894_v4  ;;  %v1007_v17 = vsel %vm991_vm1, %v2878_v56, %v964_v11  ;;  %v1028_v4 = vmul.f32 %v2977_v9, %v994_v25 }
 0x304   :  { %v3018_v12 = vadd.f32 %v1111_v36, %v1036_v26  ;;  %v1035_v37 = vadd.f32 %v1019_v21, %v2796_v19  ;;  %v3056_v43 = vadd.f32 %v1109_v3, %v1034_v30  ;;  %v1027_v44 = vmul.f32 %v2833_v22, %v998_v63 }
 0x305   :  { %v995_v36 = vsel %vm991_vm1, %v2943_v55, %v2878_v56  ;;  %v1044_v30 = vadd.f32 %v1028_v4, %v2798_v42 }
 0x306   :  { %v1143_v59 = vpack.c.bf16 %v3016_v58, %v3018_v12  ;;  %v3058_v60 = vadd.f32 %v1110_v48, %v1035_v37  ;;  %v1043_v35 = vadd.f32 %v1027_v44, %v2805_v8  ;;  %v1029_v8 = vmul.f32 %v2955_v45, %v1007_v17 }
 0x308   :  { %1469 = vmatmul.bf16.vlgmr.msra.gmra.mxu3 %v1143_v59  ;;  %v962_v19 = vpop.permute.xlu1 %961  ;;  %v1003_v59 = vsel %vm991_vm1, %v964_v11, %v2845_v31  ;;  %v1032_v11 = vmul.f32 %v2977_v9, %v995_v36 }
 0x309   :  { %v1030_v38 = vmul.f32 %v3023_v6, %v1003_v59  ;;  %v1002_v21 = vsel %vm991_vm1, %v962_v19, %v2880_v40 }
 0x317   :  { %v1069_v27 = vpop.permute.xlu0 %1068 }
 0x318   :  { %v1084_v34 = vsel %vm1082_vm2, %v1069_v27, %v1077_v18  ;;  %v1088_v10 = vsel %vm1082_vm2, %v2927_v14, %v1069_v27  ;;  %v1079_v14 = vpop.permute.xlu2 %1078  ;;  %v1026_v27 = vmul.f32 %v3023_v6, %v1002_v21 }
 0x319   :  { %v1113_v7 = vmul.f32 %v3037_v13, %v1088_v10  ;;  %v1114_v23 = vmul.f32 %v1102_v53, %v1084_v34  ;;  %v1097_v3 = vsel %vm1082_vm2, %v1079_v14, %v1055_v20  ;;  %v1048_v10 = vadd.f32 %v1032_v11, %v2801_v51 }
 0x31a   :  { %v1119_v34 = vmul.f32 %v2986_v32, %v1097_v3 }
 0x31b   :  { %v3060_v33 = vadd.f32 %v1113_v7, %v1038_v24  ;;  %v3063_v57 = vadd.f32 %v1114_v23, %v2847_v29  ;;  %v999_v29 = vsel %vm991_vm1, %v2845_v31, %v2943_v55  ;;  %v1006_v31 = vsel %vm991_vm1, %v2929_v28, %v962_v19 }
 0x31c   :  { %v1031_v26 = vmul.f32 %v2833_v22, %v999_v29  ;;  %v1025_v9 = vmul.f32 %v2955_v45, %v1006_v31  ;;  %v1045_v24 = vadd.f32 %v1029_v8, %v2794_v47  ;;  %v1046_v45 = vadd.f32 %v1030_v38, %v2778_v52 }
 0x31d   :  { %v1141_v18 = vpack.c.bf16 %v3060_v33, %v3056_v43  ;;  %v1142_v5 = vpack.c.bf16 %v3063_v57, %v3058_v60  ;;  %v1042_v47 = vadd.f32 %v1026_v27, %v2773_v62  ;;  %v3141_v19 = vadd.f32 %v1119_v34, %v1044_v30 }
 0x31e   :  { %v1047_v1 = vadd.f32 %v1031_v26, %v2809_v54  ;;  %v1041_v23 = vadd.f32 %v1025_v9, %v2788_v41 }
 0x31f   :  { %1431 = vmatmul.bf16.vlgmr.msra.gmra.mxu1 %v1141_v18  ;;  %1450 = vmatmul.bf16.vlgmr.msrb.gmra.mxu2 %v1142_v5  ;;  %v1081_v50 = vpop.permute.xlu0 %1080 }
 0x320   :  { %v1063_v22 = vpop.permute.xlu2 %1062 }
 0x321   :  { %v1093_v54 = vsel %vm1082_vm2, %v1055_v20, %v1063_v22 }
 0x322   :  { %v1116_v20 = vmul.f32 %v2964_v16, %v1093_v54 }
 0x324   :  { %v3143_v41 = vadd.f32 %v1116_v20, %v1041_v23  ;;  %v1480_v20 = vld [vmem:[%s3208_s10] sm:$0xf]  ;;  %v2059_v23 = vld [vmem:[%s3209_s11 + $0x8] sm:$0xff] }
 0x327   :  { %v1073_v49 = vpop.permute.xlu1 %1072  ;;  %v1071_v15 = vpop.permute.xlu0 %1070 }
 0x328   :  { %v1086_v2 = vsel %vm1082_vm2, %v1073_v49, %v1081_v50  ;;  %v1085_v55 = vsel %vm1082_vm2, %v1071_v15, %v1079_v14 }
 0x329   :  { %v1122_v56 = vmul.f32 %v1102_v53, %v1086_v2  ;;  %v1118_v0 = vmul.f32 %v1102_v53, %v1085_v55  ;;  %v1089_v53 = vsel %vm1082_vm2, %v1063_v22, %v1071_v15 }
 0x32a   :  { %v1117_v37 = vmul.f32 %v3037_v13, %v1089_v53 }
 0x32b   :  { %v3113_v48 = vadd.f32 %v1122_v56, %v1047_v1  ;;  %v3115_v28 = vadd.f32 %v1118_v0, %v1043_v35 }
 0x32c   :  { %v3145_v63 = vadd.f32 %v1117_v37, %v1042_v47 }
 0x32d   :  { %v1146_v40 = vpack.c.bf16 %v3113_v48, %v3115_v28 }
 0x32f   :  { %1455 = vmatmul.bf16.gmra.mxu2 %v1146_v40  ;;  %v1065_v7 = vpop.permute.xlu0 %1064  ;;  %v1057_v6 = vpop.permute.xlu1 %1056 }
 0x330   :  { %v1090_v42 = vsel %vm1082_vm2, %v1065_v7, %v1073_v49  ;;  %v1094_v18 = vsel %vm1082_vm2, %v1057_v6, %v1065_v7  ;;  %v1098_v51 = vsel %vm1082_vm2, %v1081_v50, %v1057_v6  ;;  %v2058_v7 = vld [vmem:[%s3209_s11] sm:$0xff] }
 0x331   :  { %v1121_v52 = vmul.f32 %v3037_v13, %v1090_v42  ;;  %v1120_v5 = vmul.f32 %v2964_v16, %v1094_v18  ;;  %v1123_v14 = vmul.f32 %v2986_v32, %v1098_v51  ;;  %v1624_v42 = vld [vmem:[%s3207_s9] sm:$0xff]  ;;  %s2118_s9 = smov [#allocation2]  }
 0x332   :  { %1626 = vst [vmem:[#allocation1] ss:$4 sm:$0xff] %v1624_v42  ;;  %s1759_s11 = sshll.u32 %s2118_s9, 4  ;;  %s1760_s11 = int_to_ptr.vmem [resolvable:$true] %s1759_s11 }
 0x333   :  { %v3147_v29 = vadd.f32 %v1121_v52, %v1046_v45  ;;  %v3149_v44 = vadd.f32 %v1120_v5, %v1045_v24  ;;  %v3151_v61 = vadd.f32 %v1123_v14, %v1048_v10 }
 0x335   :  { %v1144_v62 = vpack.c.bf16 %v3149_v44, %v3143_v41  ;;  %v1145_v16 = vpack.c.bf16 %v3147_v29, %v3145_v63  ;;  %v1147_v32 = vpack.c.bf16 %v3151_v61, %v3141_v19 }
 0x337   :  { %1417 = vmatmul.bf16.gmra.mxu0 %v1144_v62  ;;  %1436 = vmatmul.bf16.gmra.mxu1 %v1145_v16 }
 0x338   :  { %1474 = vmatmul.bf16.gmra.mxu3 %v1147_v32 }
 0x339   :  { %v1627_v47 = vld.sshfl [vmem:[#allocation1] sm:$0xff pattern:$0x73625140]  ;;  %v1628_v5 = vld.sshfl [vmem:[#allocation1 + $0x8] sm:$0xff pattern:$0x73625140] }
 0x33a   :  { %v1639_v52 = vsel %vm1638_vm6, %v1627_v47, 0  ;;  %v1641_v14 = vsel %vm1638_vm6, %v1628_v5, 0  ;;  %v1629_v62 = vld.sshfl [vmem:[#allocation1 + $0x10] sm:$0xff pattern:$0x73625140] }
 0x33b   :  { %1654 = vmatpush.bf16.msra.mxu2 %v1639_v52  ;;  %1673 = vmatpush.bf16.msrb.mxu3 %v1641_v14  ;;  %v1643_v16 = vsel %vm1638_vm6, %v1629_v62, 0  ;;  %v1630_v32 = vld.sshfl [vmem:[#allocation1 + $0x18] sm:$0xff pattern:$0x73625140] }
 0x380   :  { %v1413_v13 = vpop.f32.mrf.mxu0 }
 0x388   :  { %v1415_v36 = vpop.f32.mrf.mxu0 }
 0x38b   :  { %v1470_v26 = vpop.f32.mrf.mxu3 }
 0x393   :  { %v1472_v49 = vpop.f32.mrf.mxu3 }
 0x39c   :  { %v1432_v50 = vpop.f32.mrf.mxu1 }
 0x39d   :  { %v1433_v11 = vadd.f32 %v1432_v50, %v1413_v13  ;;  %v1645_v13 = vsel %vm1638_vm6, %v1630_v32, 0 }
 0x3a2   :  { %v1451_v25 = vpop.f32.mrf.mxu2 }
 0x3a3   :  { %v1452_v54 = vadd.f32 %v1451_v25, %v1433_v11 }
 0x3a4   :  { %v1434_v59 = vpop.f32.mrf.mxu1 }
 0x3a5   :  { %v1435_v56 = vadd.f32 %v1434_v59, %v1415_v36  ;;  %v1471_v30 = vadd.f32 %v1470_v26, %v1452_v54 }
 0x3aa   :  { %v1453_v17 = vpop.f32.mrf.mxu2 }
 0x3ab   :  { %v1454_v8 = vadd.f32 %v1453_v17, %v1435_v56 }
 0x3ad   :  { %v1473_v27 = vadd.f32 %v1472_v49, %v1454_v8 }
 0x3af   :  { %v1481_v34 = vpack.c.bf16 %v1473_v27, %v1471_v30 }
 0x3b2   :  { %v1456_v4 = vpop.f32.mrf.mxu2 }
 0x3b4   :  { %v1418_v15 = vpop.f32.mrf.mxu0  ;;  %v1437_v35 = vpop.f32.mrf.mxu1 }
 0x3b5   :  { %v1438_v1 = vadd.f32 %v1437_v35, %v1418_v15 }
 0x3b7   :  { %v1457_v38 = vadd.f32 %v1456_v4, %v1438_v1 }
 0x3ba   :  { %v1458_v0 = vpop.f32.mrf.mxu2 }
 0x3bb   :  { %v1475_v22 = vpop.f32.mrf.mxu3 }
 0x3bc   :  { %v1420_v2 = vpop.f32.mrf.mxu0  ;;  %v1439_v55 = vpop.f32.mrf.mxu1  ;;  %v1476_v9 = vadd.f32 %v1475_v22, %v1457_v38 }
 0x3bd   :  { %v1440_v31 = vadd.f32 %v1439_v55, %v1420_v2 }
 0x3bf   :  { %v1459_v21 = vadd.f32 %v1458_v0, %v1440_v31 }
 0x3c3   :  { %v1477_v3 = vpop.f32.mrf.mxu3 }
 0x3c4   :  { %v1478_v53 = vadd.f32 %v1477_v3, %v1459_v21 }
 0x3c6   :  { %v1482_v40 = vpack.c.bf16 %v1478_v53, %v1476_v9 }
 0x3c8   :  { %1493 = vmatpush.bf16.msrb.mxu0 %v1482_v40 }
 0x3cc   :  { %1494 = vmatpush.bf16.msrb.mxu0 %v1481_v34 }
 0x3cf   :  { %1989 = vmatmul.msk.bf16.vlgmr.msrb.gmra.mxu0 %vm1483_vm3, %v1480_v20 }
 0x3d0   :  { %1692 = vmatpush.bf16.msra.mxu0 %v1643_v16 }
 0x44c   :  { %v1496_v10 = vpop.f32.mrf.mxu0 }
 0x44d   :  { %v1500_v24 = vmax.f32 %v1496_v10, 0.0 }
 0x44f   :  { %v1505_v45 = vpack.c.bf16 %v1500_v24, %v1500_v24 }
 0x451   :  { %v1525_v37 = vsel %vm1523_vm4, %v1505_v45, 0 }
 0x452   :  { %1534 = vmatpush.bf16.msrb.mxu1 %v1525_v37 }
 0x454   :  { %v1498_v6 = vpop.f32.mrf.mxu0 }
 0x455   :  { %1998 = vmatmul.msk.bf16.vlgmr.msrb.gmra.mxu1 %vm1516_vm5, %v2058_v7 }
 0x456   :  { %1711 = vmatpush.bf16.msra.mxu1 %v1645_v13 }
 0x465   :  { %1999 = vmatmul.msk.bf16.gmra.mxu1 %vm1516_vm5, %v2059_v23 }
 0x4d2   :  { %v1536_v18 = vpop.f32.mrf.mxu1 }
 0x4d3   :  { %v2000_v51 = vmul.f32 -1.442695, %v1536_v18 }
 0x4d5   :  { %2073 = vpow2.f32 %v2000_v51 }
 0x4da   :  { %v1538_v50 = vpop.f32.mrf.mxu1 }
 0x4db   :  { %v2074_v25 = vpop.eup %2073  ;;  %v2001_v26 = vmul.f32 -1.442695, %v1538_v50 }
 0x4dc   :  { %v1558_v36 = vadd.f32 1.0, %v2074_v25 }
 0x4dd   :  { %2075 = vpow2.f32 %v2001_v26 }
 0x4de   :  { %2077 = vrcp.f32 %v1558_v36  ;;  %vm1567_vm8 = vweird.f32 %v1558_v36  ;;  %v1573_v21 = vand.u32 2147483648, %v1558_v36  ;;  %v1571_v54 = vand.u32 2147483647, %v1558_v36 }
 0x4e0   :  { %v1574_v20 = vor.u32 1.1754944e-38, %v1573_v21  ;;  %vm1572_vm13 = vcmp.eq.f32.partialorder %v1571_v54, 8.507059e+37 }
 0x4e2   :  { %v1541_v59 = vpop.f32.mrf.mxu1 }
 0x4e3   :  { %v2076_v17 = vpop.eup %2075  ;;  %v2002_v49 = vmul.f32 -1.442695, %v1541_v59 }
 0x4e4   :  { %v2078_v15 = vpop.eup %2077  ;;  %v1559_v35 = vadd.f32 1.0, %v2076_v17 }
 0x4e5   :  { %v1563_v4 = vmul.f32 %v2078_v15, %v1558_v36  ;;  %2079 = vpow2.f32 %v2002_v49  ;;  %vm1568_vm7 = vweird.f32 %v2078_v15 }
 0x4e6   :  { %2081 = vrcp.f32 %v1559_v35  ;;  %v1588_v3 = vand.u32 2147483648, %v1559_v35  ;;  %v1586_v53 = vand.u32 2147483647, %v1559_v35  ;;  %vm1569_vm10 = vmor %vm1567_vm8, %vm1568_vm7  ;;  %vm1582_vm11 = vweird.f32 %v1559_v35 }
 0x4e7   :  { %v1564_v22 = vsub.f32 1.0, %v1563_v4 }
 0x4e8   :  { %v1589_v10 = vor.u32 1.1754944e-38, %v1588_v3  ;;  %vm1587_vm14 = vcmp.eq.f32.partialorder %v1586_v53, 8.507059e+37 }
 0x4e9   :  { %v1565_v1 = vmul.f32 %v2078_v15, %v1564_v22 }
 0x4ea   :  { %v1543_v2 = vpop.f32.mrf.mxu1 }
 0x4eb   :  { %v2080_v55 = vpop.eup %2079  ;;  %v2003_v31 = vmul.f32 -1.442695, %v1543_v2  ;;  %v1566_v8 = vadd.f32 %v2078_v15, %v1565_v1 }
 0x4ec   :  { %v2082_v56 = vpop.eup %2081  ;;  %v1560_v0 = vadd.f32 1.0, %v2080_v55 }
 0x4ed   :  { %v1578_v11 = vmul.f32 %v2082_v56, %v1559_v35  ;;  %2083 = vpow2.f32 %v2003_v31  ;;  %vm1583_vm9 = vweird.f32 %v2082_v56  ;;  %v1570_v40 = vsel %vm1569_vm10, %v2078_v15, %v1566_v8 }
 0x4ee   :  { %2085 = vrcp.f32 %v1560_v0  ;;  %vm1584_vm12 = vmor %vm1582_vm11, %vm1583_vm9  ;;  %v1575_v7 = vsel %vm1572_vm13, %v1574_v20, %v1570_v40  ;;  %vm1597_vm1 = vweird.f32 %v1560_v0  ;;  %v1603_v14 = vand.u32 2147483648, %v1560_v0 }
 0x4ef   :  { %v1579_v38 = vsub.f32 1.0, %v1578_v11  ;;  %v1601_v16 = vand.u32 2147483647, %v1560_v0 }
 0x4f0   :  { %v1604_v26 = vor.u32 1.1754944e-38, %v1603_v14 }
 0x4f1   :  { %v1580_v9 = vmul.f32 %v2082_v56, %v1579_v38  ;;  %vm1602_vm6 = vcmp.eq.f32.partialorder %v1601_v16, 8.507059e+37 }
 0x4f3   :  { %v2084_v27 = vpop.eup %2083  ;;  %v1581_v30 = vadd.f32 %v2082_v56, %v1580_v9 }
 0x4f4   :  { %v2086_v34 = vpop.eup %2085  ;;  %v1561_v24 = vadd.f32 1.0, %v2084_v27 }
 0x4f5   :  { %v1585_v45 = vsel %vm1584_vm12, %v2082_v56, %v1581_v30  ;;  %v1593_v37 = vmul.f32 %v2086_v34, %v1560_v0  ;;  %vm1598_vm0 = vweird.f32 %v2086_v34 }
 0x4f6   :  { %v1590_v6 = vsel %vm1587_vm14, %v1589_v10, %v1585_v45  ;;  %2087 = vrcp.f32 %v1561_v24  ;;  %v1618_v62 = vand.u32 2147483648, %v1561_v24  ;;  %v1616_v13 = vand.u32 2147483647, %v1561_v24  ;;  %vm1599_vm3 = vmor %vm1597_vm1, %vm1598_vm0 }
 0x4f7   :  { %v1594_v23 = vsub.f32 1.0, %v1593_v37  ;;  %v1622_v42 = vpack.c.bf16 %v1590_v6, %v1575_v7  ;;  %vm1612_vm4 = vweird.f32 %v1561_v24 }
 0x4f8   :  { %v1619_v36 = vor.u32 1.1754944e-38, %v1618_v62  ;;  %vm1617_vm7 = vcmp.eq.f32.partialorder %v1616_v13, 8.507059e+37 }
 0x4f9   :  { %2004 = vmatmul.msk.bf16.vlgmr.msra.gmra.mxu2 %vm1631_vm15, %v1622_v42  ;;  %2006 = vmatmul.msk.bf16.vlgmr.msrb.gmra.mxu3 %vm1631_vm15, %v1622_v42  ;;  %v1595_v18 = vmul.f32 %v2086_v34, %v1594_v23 }
 0x4fa   :  { %2008 = vmatmul.msk.bf16.vlgmr.msra.gmra.mxu0 %vm1631_vm15, %v1622_v42  ;;  %2010 = vmatmul.msk.bf16.vlgmr.msra.gmra.mxu1 %vm1631_vm15, %v1622_v42 }
 0x4fb   :  { %v1596_v5 = vadd.f32 %v2086_v34, %v1595_v18 }
 0x4fc   :  { %v2088_v51 = vpop.eup %2087 }
 0x4fd   :  { %v1608_v47 = vmul.f32 %v2088_v51, %v1561_v24  ;;  %vm1613_vm2 = vweird.f32 %v2088_v51  ;;  %v1600_v50 = vsel %vm1599_vm3, %v2086_v34, %v1596_v5 }
 0x4fe   :  { %vm1614_vm5 = vmor %vm1612_vm4, %vm1613_vm2  ;;  %v1605_v17 = vsel %vm1602_vm6, %v1604_v26, %v1600_v50 }
 0x4ff   :  { %v1609_v52 = vsub.f32 1.0, %v1608_v47 }
 0x501   :  { %v1610_v32 = vmul.f32 %v2088_v51, %v1609_v52 }
 0x503   :  { %v1611_v25 = vadd.f32 %v2088_v51, %v1610_v32 }
 0x505   :  { %v1615_v59 = vsel %vm1614_vm5, %v2088_v51, %v1611_v25 }
 0x506   :  { %v1620_v49 = vsel %vm1617_vm7, %v1619_v36, %v1615_v59 }
 0x507   :  { %v1623_v15 = vpack.c.bf16 %v1620_v49, %v1605_v17 }
 0x509   :  { %2005 = vmatmul.msk.bf16.gmra.mxu2 %vm1631_vm15, %v1623_v15  ;;  %2007 = vmatmul.msk.bf16.gmra.mxu3 %vm1631_vm15, %v1623_v15 }
 0x50a   :  { %2009 = vmatmul.msk.bf16.gmra.mxu0 %vm1631_vm15, %v1623_v15  ;;  %2011 = vmatmul.msk.bf16.gmra.mxu1 %vm1631_vm15, %v1623_v15 }
 0x577   :  { %v1694_v35 = vpop.f32.mrf.mxu0  ;;  %v1713_v4 = vpop.f32.mrf.mxu1 }
 0x578   :  { %v1725_v22 = vmul.f32 %v1694_v35, %v3058_v60  ;;  %v1726_v2 = vmul.f32 %v1713_v4, %v3018_v12 }
 0x57a   :  { %1741 = vst [vmem:[#allocation2 + $0x10] sm:$0xff] %v1725_v22 }
 0x57b   :  { %1742 = vst [vmem:[#allocation2 + $0x18] sm:$0xff] %v1726_v2 }
 0x57c   :  { %v1656_v55 = vpop.f32.mrf.mxu2  ;;  %v1675_v1 = vpop.f32.mrf.mxu3 }
 0x57d   :  { %v1723_v31 = vmul.f32 %v1656_v55, %v3004_v46  ;;  %v1724_v56 = vmul.f32 %v1675_v1, %v3056_v43 }
 0x57f   :  { %1739 = vst [vmem:[#allocation2] sm:$0xff] %v1723_v31  ;;  %v1696_v0 = vpop.f32.mrf.mxu0  ;;  %v1715_v11 = vpop.f32.mrf.mxu1 }
 0x580   :  { %1740 = vst [vmem:[#allocation2 + $0x8] sm:$0xff] %v1724_v56  ;;  %v1729_v8 = vmul.f32 %v1696_v0, %v3063_v57  ;;  %v1730_v38 = vmul.f32 %v1715_v11, %v3016_v58 }
 0x582   :  { %1745 = vst [vmem:[#allocation2 + $0x30] sm:$0xff] %v1729_v8 }
 0x583   :  { %1746 = vst [vmem:[#allocation2 + $0x38] sm:$0xff] %v1730_v38 }
 0x584   :  { %v1658_v60 = vpop.f32.mrf.mxu2  ;;  %v1677_v12 = vpop.f32.mrf.mxu3 }
 0x585   :  { %v1727_v21 = vmul.f32 %v1658_v60, %v3006_v39  ;;  %v1728_v3 = vmul.f32 %v1677_v12, %v3060_v33 }
 0x587   :  { %1743 = vst [vmem:[#allocation2 + $0x20] sm:$0xff] %v1727_v21  ;;  %v1699_v46 = vpop.f32.mrf.mxu0  ;;  %v1718_v54 = vpop.f32.mrf.mxu1 }
 0x588   :  { %1744 = vst [vmem:[#allocation2 + $0x28] sm:$0xff] %v1728_v3  ;;  %v1733_v43 = vmul.f32 %v1699_v46, %v3115_v28  ;;  %v1734_v9 = vmul.f32 %v1718_v54, %v3141_v19 }
 0x58a   :  { %1749 = vst [vmem:[#allocation2 + $0x50] sm:$0xff] %v1733_v43 }
 0x58b   :  { %1750 = vst [vmem:[#allocation2 + $0x58] sm:$0xff] %v1734_v9 }
 0x58c   :  { %v1661_v57 = vpop.f32.mrf.mxu2  ;;  %v1680_v58 = vpop.f32.mrf.mxu3 }
 0x58d   :  { %v1731_v53 = vmul.f32 %v1661_v57, %v3143_v41  ;;  %v1732_v27 = vmul.f32 %v1680_v58, %v3145_v63 }
 0x58f   :  { %1747 = vst [vmem:[#allocation2 + $0x40] sm:$0xff] %v1731_v53  ;;  %v1701_v39 = vpop.f32.mrf.mxu0  ;;  %v1720_v40 = vpop.f32.mrf.mxu1 }
 0x590   :  { %1748 = vst [vmem:[#allocation2 + $0x48] sm:$0xff] %v1732_v27  ;;  %v1737_v33 = vmul.f32 %v1701_v39, %v3113_v48  ;;  %v1738_v30 = vmul.f32 %v1720_v40, %v3151_v61 }
 0x592   :  { %1753 = vst [vmem:[#allocation2 + $0x70] sm:$0xff] %v1737_v33 }
 0x593   :  { %1754 = vst [vmem:[#allocation2 + $0x78] sm:$0xff] %v1738_v30 }
 0x594   :  { %v1663_v28 = vpop.f32.mrf.mxu2  ;;  %v1682_v19 = vpop.f32.mrf.mxu3 }
 0x595   :  { %v1735_v41 = vmul.f32 %v1663_v28, %v3149_v44  ;;  %v1736_v63 = vmul.f32 %v1682_v19, %v3147_v29 }
 0x597   :  { %1751 = vst [vmem:[#allocation2 + $0x60] sm:$0xff] %v1735_v41 }
 0x598   :  { %1752 = vst [vmem:[#allocation2 + $0x68] sm:$0xff] %v1736_v63 }
 0x599   :  { %1767 = dma.vmem_to_hbm [thread:$0]  %s1760_s11, 2048, %s1762_s4, [#allocation3], %s2119_s15, %s2119_s15, %s2120_s6  }
 0x59a   :  { %2113 = dma.done.wait [#allocation3], 2048  }
 0x59b   :  { %2114 = vsyncadd [#allocation3], 4294965248 }
 0x59c   :  { %1772 = vsyncpa [#allocation3], 1 }

</bundles_post_ra>
